<compile_context>
chip_gen: v5e
topology: v5e:2x2
jax: 0.10.0
libtpu: 0.0.40
codegen_flags: <defaults>
</compile_context>

<pallas_src>
import functools
import math

import jax
import jax.numpy as jnp
from jax.experimental import pallas as pl
from jax.experimental.pallas import tpu as pltpu

_CPARAMS = pltpu.CompilerParams(dimension_semantics=("parallel",))


# ---------------------------------------------------------------------------
# Kernel 1: (x + skip) -> global avg/max pool  +  MSAM spatial-attention map
# ---------------------------------------------------------------------------

def _pool_msam_kernel(x_ref, skip_ref, rw_ref, rt_ref, cw_ref, ct_ref,
                      avg_ref, max_ref, pre_ref):
    s = x_ref[...] + skip_ref[...]                          # (C, HW)
    avg_ref[...] = jnp.mean(s, axis=1, keepdims=True)       # (C, 1)
    max_ref[...] = jnp.max(s, axis=1, keepdims=True)        # (C, 1)
    # Row-mean / col-mean broadcast back to (C, HW) via factored skinny matmuls:
    #   xw = (s @ Rw) @ Rt   with Rw (HW,H) row-indicator/W, Rt (H,HW) indicator.
    # Keeps everything lane-dense and avoids the O(HW^2) dense constants.
    xw = jnp.dot(jnp.dot(s, rw_ref[...], preferred_element_type=jnp.float32),
                 rt_ref[...], preferred_element_type=jnp.float32)   # mean over W per row
    xh = jnp.dot(jnp.dot(s, cw_ref[...], preferred_element_type=jnp.float32),
                 ct_ref[...], preferred_element_type=jnp.float32)   # mean over H per col
    qk = xw * xh                                            # outer-product map, (C, HW)
    m = jnp.max(qk, axis=1, keepdims=True)                  # softmax jointly over all H*W
    e = jnp.exp(qk - m)
    p = e * pl.reciprocal(jnp.sum(e, axis=1, keepdims=True), approx=True)
    pre_ref[...] = s * p + s


def pool_and_msam(x, skip, consts):
    B, C, HW = x.shape
    per_b = lambda b: (b, 0, 0)
    full2d = lambda b: (0, 0)
    rw, rt, cw, ct = consts['rw'], consts['rt'], consts['cw'], consts['ct']
    return pl.pallas_call(
        _pool_msam_kernel,
        out_shape=(jax.ShapeDtypeStruct((B, C, 1), jnp.float32),
                   jax.ShapeDtypeStruct((B, C, 1), jnp.float32),
                   jax.ShapeDtypeStruct((B, C, HW), jnp.float32)),
        grid=(B,),
        in_specs=[pl.BlockSpec((None, C, HW), per_b),
                  pl.BlockSpec((None, C, HW), per_b),
                  pl.BlockSpec(rw.shape, full2d),
                  pl.BlockSpec(rt.shape, full2d),
                  pl.BlockSpec(cw.shape, full2d),
                  pl.BlockSpec(ct.shape, full2d)],
        out_specs=(pl.BlockSpec((None, C, 1), per_b),
                   pl.BlockSpec((None, C, 1), per_b),
                   pl.BlockSpec((None, C, HW), per_b)),
        compiler_params=_CPARAMS,
    )(x, skip, rw, rt, cw, ct)


# ---------------------------------------------------------------------------
# Kernel 2: fused MSAM 3x3 conv + full CIAFM chain, one grid step per batch
# ---------------------------------------------------------------------------

_W_NAMES = ('w_msam', 'b_msam', 'w_qsf', 'b_c3', 'b_fq', 'w_fkt', 'b_fkt',
            'w_fv', 'b_fv', 'w_fup', 'b_fup', 'w_fuse', 'b_fuse',
            'w_c1a', 'w_c1b', 'b_c1')


def _ciafm_kernel(pre_ref, proxy_ref, proxyt_ref, mask9_ref,
                  w_msam_ref, b_msam_ref, w_qsf_ref, b_c3_ref, b_fq_ref,
                  w_fkt_ref, b_fkt_ref, w_fv_ref, b_fv_ref,
                  w_fup_ref, b_fup_ref, w_fuse_ref, b_fuse_ref,
                  w_c1a_ref, w_c1b_ref, b_c1_ref, o_ref,
                  *, img_w, att_scale):
    c, hw = pre_ref.shape
    k = b_fq_ref.shape[0]
    mask9 = mask9_ref[...]                                  # (9, HW) per-tap boundary mask

    def im2col(x):
        # (9*Cin, HW) patch matrix via lane rolls; halo padding handled entirely by
        # the per-tap mask (fused with each roll, no jnp.pad / HBM round trip).
        rows = []
        for t in range(9):
            dy, dx = t // 3 - 1, t % 3 - 1
            off = dy * img_w + dx
            xr = x if off == 0 else pltpu.roll(x, shift=(-off) % hw, axis=1)
            rows.append(xr * mask9[t:t + 1, :])
        return jnp.concatenate(rows, axis=0)

    def bias_relu6(y, b_ref):                               # BN scale already in weights
        return jnp.clip(y + b_ref[...], 0.0, 6.0)

    # MSAM 3x3 conv -> spatial-attention features (this is `x` of CIAFM)
    s_attn = bias_relu6(jnp.dot(w_msam_ref[...], im2col(pre_ref[...]),
                                preferred_element_type=jnp.float32), b_msam_ref)

    # conv3x3 / f_query / fuse(s_attn part) share one im2col patch -> one stacked dot
    patch = im2col(s_attn)
    qsf = jnp.dot(w_qsf_ref[...], patch, preferred_element_type=jnp.float32)  # (2C+K, HW)
    space = jnp.clip(qsf[:c, :] + b_c3_ref[...], 0.0, 6.0)       # conv3x3(x)   (C, HW)
    q = jnp.clip(qsf[c:c + k, :] + b_fq_ref[...], 0.0, 6.0)      # f_query(x)   (K, HW)
    fuse_s = qsf[c + k:, :]                                      # W_fuse @ im2col(s_attn)

    # f_key / f_value: 1x1 convs over the (C, N) class proxy (tiny)
    k_t = jnp.clip(jnp.dot(proxyt_ref[...], w_fkt_ref[...],
                           preferred_element_type=jnp.float32) + b_fkt_ref[...],
                   0.0, 6.0)                                                  # (N, K)
    v = bias_relu6(jnp.dot(w_fv_ref[...], proxy_ref[...],
                           preferred_element_type=jnp.float32), b_fv_ref)     # (K, N)

    # attention: softmax over the H*W (query) axis = Softmax(dim=1) in torch,
    # reduced along lanes; context produced lane-dense in (K, HW).
    logits = jnp.dot(k_t, q, preferred_element_type=jnp.float32) * att_scale  # (N, HW)
    m = jnp.max(logits, axis=1, keepdims=True)
    e = jnp.exp(logits - m)
    p = e * pl.reciprocal(jnp.sum(e, axis=1, keepdims=True), approx=True)
    ctx = jnp.dot(v, p, preferred_element_type=jnp.float32)                   # (K, HW)

    # f_up (1x1); fuse(up + s_attn) split by im2col linearity (s_attn half precomputed)
    up = bias_relu6(jnp.dot(w_fup_ref[...], ctx,
                            preferred_element_type=jnp.float32), b_fup_ref)   # (C, HW)
    fused = jnp.clip(fuse_s +
                     jnp.dot(w_fuse_ref[...], im2col(up),
                             preferred_element_type=jnp.float32) +
                     b_fuse_ref[...], 0.0, 6.0)
    # final 1x1 over [context ; space] as two summed dots (no 2C concat materialized)
    y = (jnp.dot(w_c1a_ref[...], fused, preferred_element_type=jnp.float32) +
         jnp.dot(w_c1b_ref[...], space, preferred_element_type=jnp.float32))
    o_ref[...] = jnp.clip(y + b_c1_ref[...], 0.0, 6.0)
    # TODO(synk): nn.Dropout2d(dropout_rate) is eval-mode identity and omitted.


def ciafm_fused(pre, proxy, proxy_t, mask9, kp, *, img_w, key_channels):
    B, C, HW = pre.shape
    N = proxy.shape[-1]
    weights = [kp[n] for n in _W_NAMES]
    per_b = lambda b: (b, 0, 0)
    full2d = lambda b: (0, 0)
    kernel = functools.partial(_ciafm_kernel, img_w=img_w,
                               att_scale=float(key_channels) ** -0.5)
    return pl.pallas_call(
        kernel,
        out_shape=jax.ShapeDtypeStruct((B, C, HW), jnp.float32),
        grid=(B,),
        in_specs=[pl.BlockSpec((None, C, HW), per_b),
                  pl.BlockSpec((None, C, N), per_b),
                  pl.BlockSpec((None, N, C), per_b),
                  pl.BlockSpec(mask9.shape, full2d)]
                 + [pl.BlockSpec(w.shape, full2d) for w in weights],
        out_specs=pl.BlockSpec((None, C, HW), per_b),
        compiler_params=_CPARAMS,
    )(pre, proxy, proxy_t, mask9, *weights)


# ---------------------------------------------------------------------------
# Constant helpers (factored row/col-mean indicators, conv boundary masks)
# ---------------------------------------------------------------------------

def _make_constants(H, W):
    HW = H * W
    p = jnp.arange(HW)
    row, col = p // W, p % W
    rw = (row[:, None] == jnp.arange(H)[None, :]).astype(jnp.float32) / float(W)  # (HW, H)
    rt = (jnp.arange(H)[:, None] == row[None, :]).astype(jnp.float32)             # (H, HW)
    cw = (col[:, None] == jnp.arange(W)[None, :]).astype(jnp.float32) / float(H)  # (HW, W)
    ct = (jnp.arange(W)[:, None] == col[None, :]).astype(jnp.float32)             # (W, HW)
    masks = []
    for t in range(9):
        dy, dx = t // 3 - 1, t % 3 - 1
        valid = ((row + dy >= 0) & (row + dy < H) &
                 (col + dx >= 0) & (col + dx < W))
        masks.append(valid.astype(jnp.float32))
    mask9 = jnp.stack(masks, axis=0)                                               # (9, HW)
    return {'rw': rw, 'rt': rt, 'cw': cw, 'ct': ct, 'mask9': mask9}


# ---------------------------------------------------------------------------
# Plain-JAX glue: MCAM (tiny per-channel arithmetic) and weight preparation
# ---------------------------------------------------------------------------

def _conv1d(x, w, b):
    """PyTorch Conv1d(1,1,k,padding=(k-1)//2) (cross-correlation). x: (B, L)."""
    k = w.shape[0]
    pad = (k - 1) // 2
    xp = jnp.pad(x, ((0, 0), (pad, pad)))
    idx = jnp.arange(x.shape[1])[:, None] + jnp.arange(k)[None, :]
    win = xp[:, idx]                                     # (B, L, k)
    return jnp.einsum('blk,k->bl', win, w) + b


def mcam_forward(avg, mx, p):
    """avg, mx: (B, C) pooled features -> class_matrix (B, C, num_classes)."""
    ys = [_conv1d(avg, p[f'w{i}'], p[f'b{i}']) for i in range(4)]
    ms = [_conv1d(mx, p[f'w{i}'], p[f'b{i}']) for i in range(4)]
    y_full = jnp.concatenate(ys + ms, axis=1)                       # (B, 8C)
    yc = _conv1d(y_full, p['wc'], p['bc'])                          # (B, 8C)
    y = jax.nn.sigmoid(yc @ p['fc_w'] + p['fc_b'])                  # (B, C)
    h = jnp.maximum(y @ p['cse_w1'] + p['cse_b1'], 0.0)
    y_cse = jax.nn.sigmoid(h @ p['cse_w2'] + p['cse_b2'])           # (B, nc)
    f = jax.nn.softmax((y @ p['fc1_w']) * p['fc1_scale'] + p['fc1_bias'], axis=1)
    class_feat = f + y_cse                                          # (B, nc)
    cm = y[:, :, None] * class_feat[:, None, :]                     # (B, C, nc)
    cm = jax.nn.softmax(cm, axis=1)
    cm = jax.nn.softmax(cm, axis=2)
    return cm


def _w9(p):
    cout, cin, kh, kw = p['w'].shape                     # OIHW -> (Cout, 9*Cin), tap-major
    return jnp.transpose(p['w'], (0, 2, 3, 1)).reshape(cout, kh * kw * cin)


def _w1(p):
    return p['w'][:, :, 0, 0]                            # (Cout, Cin)


def _prepare_ciafm_params(params, dim):
    """BN scale folded into weight rows; biases kept as (Cout,1)/(1,K) add-only."""
    ci, ms = params['ciafm'], params['msam']
    rowscale = lambda p, w: w * p['s'][:, None]
    colb = lambda p: p['b'][:, None]
    w_c1 = rowscale(ci['c1'], _w1(ci['c1']))             # (C, 2C): [context | space]
    return {
        'w_msam': rowscale(ms, _w9(ms)), 'b_msam': colb(ms),
        # conv3x3 branch + f_query + fuse(s_attn-part) stacked -> one im2col dot
        'w_qsf': jnp.concatenate([rowscale(ci['c3'], _w9(ci['c3'])),
                                  rowscale(ci['fq'], _w9(ci['fq'])),
                                  rowscale(ci['fuse'], _w9(ci['fuse']))], axis=0),
        'b_c3': colb(ci['c3']), 'b_fq': colb(ci['fq']),
        'w_fkt': jnp.transpose(_w1(ci['fk'])) * ci['fk']['s'][None, :],   # (C, K)
        'b_fkt': ci['fk']['b'][None, :],                                  # (1, K)
        'w_fv': rowscale(ci['fv'], _w1(ci['fv'])), 'b_fv': colb(ci['fv']),
        'w_fup': rowscale(ci['fup'], _w1(ci['fup'])), 'b_fup': colb(ci['fup']),
        'w_fuse': rowscale(ci['fuse'], _w9(ci['fuse'])), 'b_fuse': colb(ci['fuse']),
        'w_c1a': w_c1[:, :dim], 'w_c1b': w_c1[:, dim:], 'b_c1': colb(ci['c1']),
    }


def prepare_attention_params(params, *, dim, H, W):
    """One-time host-side prep: hoisted out of the jitted forward."""
    return {'consts': _make_constants(H, W),
            'ciafm': _prepare_ciafm_params(params, dim),
            'mcam': params['mcam']}


@functools.partial(jax.jit, static_argnames=('key_channels',))
def attention_forward(x_nchw, skip_nchw, prep, *, key_channels):
    B, C, H, W = x_nchw.shape
    HW = H * W
    x = x_nchw.reshape(B, C, HW).astype(jnp.float32)
    skip = skip_nchw.reshape(B, C, HW).astype(jnp.float32)
    consts = prep['consts']
    # kernel 1: pooled stats + MSAM spatial map (x+skip computed exactly once)
    avg, mx, pre = pool_and_msam(x, skip, consts)
    # MCAM channel attention (tiny scalar math, plain JAX) -> class proxy
    cm = mcam_forward(avg[..., 0], mx[..., 0], prep['mcam'])         # (B, C, nc)
    proxy = cm                                                       # channels x class-pixels
    proxy_t = jnp.transpose(cm, (0, 2, 1))                           # (B, nc, C)
    # kernel 2: fused MSAM conv + CIAFM
    out = ciafm_fused(pre, proxy, proxy_t, consts['mask9'], prep['ciafm'],
                      img_w=W, key_channels=key_channels)
    return out.reshape(B, C, H, W)


# ---------------------------------------------------------------------------
# Deterministic parameter initialization (eval-mode BN folded to scale/bias)
# ---------------------------------------------------------------------------

def _init_conv_bn(key, cin, cout, k):
    k1, k2, k3 = jax.random.split(key, 3)
    w = 0.1 * jax.random.normal(k1, (cout, cin, k, k), jnp.float32)   # OIHW
    gamma = 1.0 + 0.1 * jax.random.normal(k2, (cout,), jnp.float32)
    beta = 0.1 * jax.random.normal(k3, (cout,), jnp.float32)
    eps = 1e-5
    return {'w': w, 's': gamma / jnp.sqrt(1.0 + eps), 'b': beta}


def init_params(key, dim, num_classes):
    kk = jax.random.split(key, 16)
    # ---- MCAM ----
    t = int(abs((math.log(dim, 2) + 1) / 2))
    ksz = t if t % 2 else t + 1
    r = math.log(ksz - 1, 2)
    ksizes = [int(2 ** (r + i) + 1) for i in range(4)]
    mcam = {}
    for i, ks in enumerate(ksizes):
        sub = jax.random.split(kk[i], 2)
        mcam[f'w{i}'] = 0.1 * jax.random.normal(sub[0], (ks,), jnp.float32)
        mcam[f'b{i}'] = 0.01 * jax.random.normal(sub[1], (), jnp.float32)
    mcam['wc'] = 0.1 * jax.random.normal(kk[4], (3,), jnp.float32)
    mcam['bc'] = jnp.float32(0.01)
    mcam['fc_w'] = 0.1 * jax.random.normal(kk[5], (8 * dim, dim), jnp.float32)
    mcam['fc_b'] = 0.01 * jax.random.normal(kk[6], (dim,), jnp.float32)
    mcam['cse_w1'] = 0.1 * jax.random.normal(kk[7], (dim, dim // 4), jnp.float32)
    mcam['cse_b1'] = jnp.zeros((dim // 4,), jnp.float32)
    mcam['cse_w2'] = 0.1 * jax.random.normal(kk[8], (dim // 4, num_classes), jnp.float32)
    mcam['cse_b2'] = jnp.zeros((num_classes,), jnp.float32)
    mcam['fc1_w'] = 0.1 * jax.random.normal(kk[9], (dim, num_classes), jnp.float32)
    gamma = 1.0 + 0.1 * jax.random.normal(kk[10], (num_classes,), jnp.float32)
    mcam['fc1_scale'] = gamma / jnp.sqrt(1.0 + 1e-5)
    mcam['fc1_bias'] = jnp.zeros((num_classes,), jnp.float32)
    # ---- MSAM ----
    msam = _init_conv_bn(kk[11], dim, dim, 3)
    # ---- CIAFM ----
    K = dim // 2
    c = jax.random.split(kk[12], 7)
    ciafm = {
        'fq': _init_conv_bn(c[0], dim, K, 3),
        'fk': _init_conv_bn(c[1], dim, K, 1),
        'fv': _init_conv_bn(c[2], dim, K, 1),
        'fup': _init_conv_bn(c[3], K, dim, 1),
        'fuse': _init_conv_bn(c[4], dim, dim, 3),
        'c3': _init_conv_bn(c[5], dim, dim, 3),
        'c1': _init_conv_bn(c[6], 2 * dim, dim, 1),
    }
    return {'mcam': mcam, 'msam': msam, 'ciafm': ciafm}


# ---------------------------------------------------------------------------

if __name__ == "__main__":
    B, DIM, NUM_CLASSES, SIZE = 2, 8, 4, 16

    root = jax.random.PRNGKey(0)
    k_param, k_x, k_skip = jax.random.split(root, 3)
    params = init_params(k_param, DIM, NUM_CLASSES)
    # One-time prep (constants + BN-folded, stacked weights) — outside the jit.
    prep = prepare_attention_params(params, dim=DIM, H=SIZE, W=SIZE)

    x = jax.random.normal(k_x, (B, DIM, SIZE, SIZE), jnp.float32)      # NCHW, like torch
    skip = jax.random.normal(k_skip, (B, DIM, SIZE, SIZE), jnp.float32)

    out = attention_forward(x, skip, prep, key_channels=DIM // 2)
    out = jax.block_until_ready(out)
    assert out.shape == (B, DIM, SIZE, SIZE)
    print("KERNEL_OK")
</pallas_src>

<mosaic_0001>
module attributes {stable_mosaic.version = 11 : i64} {
  func.func @_pool_msam_kernel(%arg0: i32, %arg1: memref<1x8x256xf32, #tpu.memory_space<vmem>>, %arg2: memref<1x8x256xf32, #tpu.memory_space<vmem>>, %arg3: memref<256x16xf32, #tpu.memory_space<vmem>>, %arg4: memref<16x256xf32, #tpu.memory_space<vmem>>, %arg5: memref<256x16xf32, #tpu.memory_space<vmem>>, %arg6: memref<16x256xf32, #tpu.memory_space<vmem>>, %arg7: memref<1x8x1xf32, #tpu.memory_space<vmem>>, %arg8: memref<1x8x1xf32, #tpu.memory_space<vmem>>, %arg9: memref<1x8x256xf32, #tpu.memory_space<vmem>>) attributes {dimension_semantics = [#tpu.dimension_semantics<parallel>], iteration_bounds = array<i64: 2>, scalar_prefetch = 0 : i64, scratch_operands = 0 : i64, tpu.core_type = #tpu.core_type<tc>, window_params = [{transform_indices = @transform_0, window_bounds = array<i64: 1, 8, 256>}, {transform_indices = @transform_1, window_bounds = array<i64: 1, 8, 256>}, {pipeline_mode = #tpu.pipeline_mode<synchronous>, transform_indices = @transform_2, window_bounds = array<i64: 256, 16>}, {pipeline_mode = #tpu.pipeline_mode<synchronous>, transform_indices = @transform_3, window_bounds = array<i64: 16, 256>}, {pipeline_mode = #tpu.pipeline_mode<synchronous>, transform_indices = @transform_4, window_bounds = array<i64: 256, 16>}, {pipeline_mode = #tpu.pipeline_mode<synchronous>, transform_indices = @transform_5, window_bounds = array<i64: 16, 256>}, {transform_indices = @transform_6, window_bounds = array<i64: 1, 8, 1>}, {transform_indices = @transform_7, window_bounds = array<i64: 1, 8, 1>}, {transform_indices = @transform_8, window_bounds = array<i64: 1, 8, 256>}]} {
    %c0 = arith.constant 0 : index
    %c0_0 = arith.constant 0 : index
    %c0_1 = arith.constant 0 : index
    %0 = vector.load %arg1[%c0, %c0_0, %c0_1] : memref<1x8x256xf32, #tpu.memory_space<vmem>>, vector<1x8x256xf32>
    %1 = vector.shape_cast %0 : vector<1x8x256xf32> to vector<8x256xf32>
    %c0_2 = arith.constant 0 : index
    %c0_3 = arith.constant 0 : index
    %c0_4 = arith.constant 0 : index
    %2 = vector.load %arg2[%c0_2, %c0_3, %c0_4] : memref<1x8x256xf32, #tpu.memory_space<vmem>>, vector<1x8x256xf32>
    %3 = vector.shape_cast %2 : vector<1x8x256xf32> to vector<8x256xf32>
    %4 = arith.addf %1, %3 : vector<8x256xf32>
    %cst = arith.constant dense<0.000000e+00> : vector<8xf32>
    %5 = vector.multi_reduction <add>, %4, %cst [1] : vector<8x256xf32> to vector<8xf32>
    %6 = vector.shape_cast %5 : vector<8xf32> to vector<8x1xf32>
    %cst_5 = arith.constant 2.560000e+02 : f32
    %7 = vector.broadcast %cst_5 : f32 to vector<8x1xf32>
    %8 = arith.divf %6, %7 : vector<8x1xf32>
    %c0_6 = arith.constant 0 : index
    %c0_7 = arith.constant 0 : index
    %c0_8 = arith.constant 0 : index
    %9 = vector.load %arg7[%c0_6, %c0_7, %c0_8] : memref<1x8x1xf32, #tpu.memory_space<vmem>>, vector<1x8x1xf32>
    %10 = vector.shape_cast %9 : vector<1x8x1xf32> to vector<8x1xf32>
    %11 = vector.shape_cast %8 : vector<8x1xf32> to vector<1x8x1xf32>
    tpu.vector_store %arg7[%c0_6, %c0_7, %c0_8], %11 {strides = array<i32>} : memref<1x8x1xf32, #tpu.memory_space<vmem>>, vector<1x8x1xf32>,
    %cst_9 = arith.constant dense<0xFF800000> : vector<8xf32>
    %12 = vector.multi_reduction <maximumf>, %4, %cst_9 [1] : vector<8x256xf32> to vector<8xf32>
    %13 = vector.shape_cast %12 : vector<8xf32> to vector<8x1xf32>
    %c0_10 = arith.constant 0 : index
    %c0_11 = arith.constant 0 : index
    %c0_12 = arith.constant 0 : index
    %14 = vector.load %arg8[%c0_10, %c0_11, %c0_12] : memref<1x8x1xf32, #tpu.memory_space<vmem>>, vector<1x8x1xf32>
    %15 = vector.shape_cast %14 : vector<1x8x1xf32> to vector<8x1xf32>
    %16 = vector.shape_cast %13 : vector<8x1xf32> to vector<1x8x1xf32>
    tpu.vector_store %arg8[%c0_10, %c0_11, %c0_12], %16 {strides = array<i32>} : memref<1x8x1xf32, #tpu.memory_space<vmem>>, vector<1x8x1xf32>,
    %c0_13 = arith.constant 0 : index
    %c0_14 = arith.constant 0 : index
    %17 = vector.load %arg3[%c0_13, %c0_14] : memref<256x16xf32, #tpu.memory_space<vmem>>, vector<256x16xf32>
    %cst_15 = arith.constant dense<0.000000e+00> : vector<8x16xf32>
    %18 = tpu.matmul %4, %17, %cst_15 {dimension_numbers = #tpu.dot_dimension_numbers<[1], [0], [0], [1], [0, 0, 1, 1], [], []>} : vector<8x256xf32>, vector<256x16xf32>, vector<8x16xf32> -> vector<8x16xf32>
    %c0_16 = arith.constant 0 : index
    %c0_17 = arith.constant 0 : index
    %19 = vector.load %arg4[%c0_16, %c0_17] : memref<16x256xf32, #tpu.memory_space<vmem>>, vector<16x256xf32>
    %cst_18 = arith.constant dense<0.000000e+00> : vector<8x256xf32>
    %20 = tpu.matmul %18, %19, %cst_18 {dimension_numbers = #tpu.dot_dimension_numbers<[1], [0], [0], [1], [0, 0, 1, 1], [], []>} : vector<8x16xf32>, vector<16x256xf32>, vector<8x256xf32> -> vector<8x256xf32>
    %c0_19 = arith.constant 0 : index
    %c0_20 = arith.constant 0 : index
    %21 = vector.load %arg5[%c0_19, %c0_20] : memref<256x16xf32, #tpu.memory_space<vmem>>, vector<256x16xf32>
    %cst_21 = arith.constant dense<0.000000e+00> : vector<8x16xf32>
    %22 = tpu.matmul %4, %21, %cst_21 {dimension_numbers = #tpu.dot_dimension_numbers<[1], [0], [0], [1], [0, 0, 1, 1], [], []>} : vector<8x256xf32>, vector<256x16xf32>, vector<8x16xf32> -> vector<8x16xf32>
    %c0_22 = arith.constant 0 : index
    %c0_23 = arith.constant 0 : index
    %23 = vector.load %arg6[%c0_22, %c0_23] : memref<16x256xf32, #tpu.memory_space<vmem>>, vector<16x256xf32>
    %cst_24 = arith.constant dense<0.000000e+00> : vector<8x256xf32>
    %24 = tpu.matmul %22, %23, %cst_24 {dimension_numbers = #tpu.dot_dimension_numbers<[1], [0], [0], [1], [0, 0, 1, 1], [], []>} : vector<8x16xf32>, vector<16x256xf32>, vector<8x256xf32> -> vector<8x256xf32>
    %25 = arith.mulf %20, %24 : vector<8x256xf32>
    %cst_25 = arith.constant dense<0xFF800000> : vector<8xf32>
    %26 = vector.multi_reduction <maximumf>, %25, %cst_25 [1] : vector<8x256xf32> to vector<8xf32>
    %27 = vector.shape_cast %26 : vector<8xf32> to vector<8x1xf32>
    %28 = vector.broadcast %27 : vector<8x1xf32> to vector<8x256xf32>
    %29 = arith.subf %25, %28 : vector<8x256xf32>
    %30 = math.exp %29 : vector<8x256xf32>
    %cst_26 = arith.constant dense<0.000000e+00> : vector<8xf32>
    %31 = vector.multi_reduction <add>, %30, %cst_26 [1] : vector<8x256xf32> to vector<8xf32>
    %32 = vector.shape_cast %31 : vector<8xf32> to vector<8x1xf32>
    %33 = tpu.reciprocal %32 {approx = true} : vector<8x1xf32> -> vector<8x1xf32>
    %34 = vector.broadcast %33 : vector<8x1xf32> to vector<8x256xf32>
    %35 = arith.mulf %30, %34 : vector<8x256xf32>
    %36 = arith.mulf %4, %35 : vector<8x256xf32>
    %37 = arith.addf %36, %4 : vector<8x256xf32>
    %c0_27 = arith.constant 0 : index
    %c0_28 = arith.constant 0 : index
    %c0_29 = arith.constant 0 : index
    %38 = vector.load %arg9[%c0_27, %c0_28, %c0_29] : memref<1x8x256xf32, #tpu.memory_space<vmem>>, vector<1x8x256xf32>
    %39 = vector.shape_cast %38 : vector<1x8x256xf32> to vector<8x256xf32>
    %40 = vector.shape_cast %37 : vector<8x256xf32> to vector<1x8x256xf32>
    tpu.vector_store %arg9[%c0_27, %c0_28, %c0_29], %40 {strides = array<i32>} : memref<1x8x256xf32, #tpu.memory_space<vmem>>, vector<1x8x256xf32>,
    return
  }
  func.func @transform_0(%arg0: i32) -> (i32, i32, i32) {
    %c0_i32 = arith.constant 0 : i32
    %c0_i32_0 = arith.constant 0 : i32
    %c0_i32_1 = arith.constant 0 : i32
    return %arg0, %c0_i32, %c0_i32_0 : i32, i32, i32
  }
  func.func @transform_1(%arg0: i32) -> (i32, i32, i32) {
    %c0_i32 = arith.constant 0 : i32
    %c0_i32_0 = arith.constant 0 : i32
    %c0_i32_1 = arith.constant 0 : i32
    return %arg0, %c0_i32, %c0_i32_0 : i32, i32, i32
  }
  func.func @transform_2(%arg0: i32) -> (i32, i32) {
    %c0_i32 = arith.constant 0 : i32
    %c0_i32_0 = arith.constant 0 : i32
    %c0_i32_1 = arith.constant 0 : i32
    return %c0_i32, %c0_i32_0 : i32, i32
  }
  func.func @transform_3(%arg0: i32) -> (i32, i32) {
    %c0_i32 = arith.constant 0 : i32
    %c0_i32_0 = arith.constant 0 : i32
    %c0_i32_1 = arith.constant 0 : i32
    return %c0_i32, %c0_i32_0 : i32, i32
  }
  func.func @transform_4(%arg0: i32) -> (i32, i32) {
    %c0_i32 = arith.constant 0 : i32
    %c0_i32_0 = arith.constant 0 : i32
    %c0_i32_1 = arith.constant 0 : i32
    return %c0_i32, %c0_i32_0 : i32, i32
  }
  func.func @transform_5(%arg0: i32) -> (i32, i32) {
    %c0_i32 = arith.constant 0 : i32
    %c0_i32_0 = arith.constant 0 : i32
    %c0_i32_1 = arith.constant 0 : i32
    return %c0_i32, %c0_i32_0 : i32, i32
  }
  func.func @transform_6(%arg0: i32) -> (i32, i32, i32) {
    %c0_i32 = arith.constant 0 : i32
    %c0_i32_0 = arith.constant 0 : i32
    %c0_i32_1 = arith.constant 0 : i32
    return %arg0, %c0_i32, %c0_i32_0 : i32, i32, i32
  }
  func.func @transform_7(%arg0: i32) -> (i32, i32, i32) {
    %c0_i32 = arith.constant 0 : i32
    %c0_i32_0 = arith.constant 0 : i32
    %c0_i32_1 = arith.constant 0 : i32
    return %arg0, %c0_i32, %c0_i32_0 : i32, i32, i32
  }
  func.func @transform_8(%arg0: i32) -> (i32, i32, i32) {
    %c0_i32 = arith.constant 0 : i32
    %c0_i32_0 = arith.constant 0 : i32
    %c0_i32_1 = arith.constant 0 : i32
    return %arg0, %c0_i32, %c0_i32_0 : i32, i32, i32
  }
}

module attributes {stable_mosaic.version = 11 : i64} {
  func.func @_ciafm_kernel(%arg0: i32, %arg1: memref<1x8x256xf32, #tpu.memory_space<vmem>>, %arg2: memref<1x8x4xf32, #tpu.memory_space<vmem>>, %arg3: memref<1x4x8xf32, #tpu.memory_space<vmem>>, %arg4: memref<9x256xf32, #tpu.memory_space<vmem>>, %arg5: memref<8x72xf32, #tpu.memory_space<vmem>>, %arg6: memref<8x1xf32, #tpu.memory_space<vmem>>, %arg7: memref<20x72xf32, #tpu.memory_space<vmem>>, %arg8: memref<8x1xf32, #tpu.memory_space<vmem>>, %arg9: memref<4x1xf32, #tpu.memory_space<vmem>>, %arg10: memref<8x4xf32, #tpu.memory_space<vmem>>, %arg11: memref<1x4xf32, #tpu.memory_space<vmem>>, %arg12: memref<4x8xf32, #tpu.memory_space<vmem>>, %arg13: memref<4x1xf32, #tpu.memory_space<vmem>>, %arg14: memref<8x4xf32, #tpu.memory_space<vmem>>, %arg15: memref<8x1xf32, #tpu.memory_space<vmem>>, %arg16: memref<8x72xf32, #tpu.memory_space<vmem>>, %arg17: memref<8x1xf32, #tpu.memory_space<vmem>>, %arg18: memref<8x8xf32, #tpu.memory_space<vmem>>, %arg19: memref<8x8xf32, #tpu.memory_space<vmem>>, %arg20: memref<8x1xf32, #tpu.memory_space<vmem>>, %arg21: memref<1x8x256xf32, #tpu.memory_space<vmem>>) attributes {dimension_semantics = [#tpu.dimension_semantics<parallel>], iteration_bounds = array<i64: 2>, scalar_prefetch = 0 : i64, scratch_operands = 0 : i64, tpu.core_type = #tpu.core_type<tc>, window_params = [{transform_indices = @transform_0, window_bounds = array<i64: 1, 8, 256>}, {transform_indices = @transform_1, window_bounds = array<i64: 1, 8, 4>}, {transform_indices = @transform_2, window_bounds = array<i64: 1, 4, 8>}, {pipeline_mode = #tpu.pipeline_mode<synchronous>, transform_indices = @transform_3, window_bounds = array<i64: 9, 256>}, {pipeline_mode = #tpu.pipeline_mode<synchronous>, transform_indices = @transform_4, window_bounds = array<i64: 8, 72>}, {pipeline_mode = #tpu.pipeline_mode<synchronous>, transform_indices = @transform_5, window_bounds = array<i64: 8, 1>}, {pipeline_mode = #tpu.pipeline_mode<synchronous>, transform_indices = @transform_6, window_bounds = array<i64: 20, 72>}, {pipeline_mode = #tpu.pipeline_mode<synchronous>, transform_indices = @transform_7, window_bounds = array<i64: 8, 1>}, {pipeline_mode = #tpu.pipeline_mode<synchronous>, transform_indices = @transform_8, window_bounds = array<i64: 4, 1>}, {pipeline_mode = #tpu.pipeline_mode<synchronous>, transform_indices = @transform_9, window_bounds = array<i64: 8, 4>}, {pipeline_mode = #tpu.pipeline_mode<synchronous>, transform_indices = @transform_10, window_bounds = array<i64: 1, 4>}, {pipeline_mode = #tpu.pipeline_mode<synchronous>, transform_indices = @transform_11, window_bounds = array<i64: 4, 8>}, {pipeline_mode = #tpu.pipeline_mode<synchronous>, transform_indices = @transform_12, window_bounds = array<i64: 4, 1>}, {pipeline_mode = #tpu.pipeline_mode<synchronous>, transform_indices = @transform_13, window_bounds = array<i64: 8, 4>}, {pipeline_mode = #tpu.pipeline_mode<synchronous>, transform_indices = @transform_14, window_bounds = array<i64: 8, 1>}, {pipeline_mode = #tpu.pipeline_mode<synchronous>, transform_indices = @transform_15, window_bounds = array<i64: 8, 72>}, {pipeline_mode = #tpu.pipeline_mode<synchronous>, transform_indices = @transform_16, window_bounds = array<i64: 8, 1>}, {pipeline_mode = #tpu.pipeline_mode<synchronous>, transform_indices = @transform_17, window_bounds = array<i64: 8, 8>}, {pipeline_mode = #tpu.pipeline_mode<synchronous>, transform_indices = @transform_18, window_bounds = array<i64: 8, 8>}, {pipeline_mode = #tpu.pipeline_mode<synchronous>, transform_indices = @transform_19, window_bounds = array<i64: 8, 1>}, {transform_indices = @transform_20, window_bounds = array<i64: 1, 8, 256>}]} {
    %c0 = arith.constant 0 : index
    %c0_0 = arith.constant 0 : index
    %0 = vector.load %arg4[%c0, %c0_0] : memref<9x256xf32, #tpu.memory_space<vmem>>, vector<9x256xf32>
    %c0_1 = arith.constant 0 : index
    %c0_2 = arith.constant 0 : index
    %1 = vector.load %arg5[%c0_1, %c0_2] : memref<8x72xf32, #tpu.memory_space<vmem>>, vector<8x72xf32>
    %c0_3 = arith.constant 0 : index
    %c0_4 = arith.constant 0 : index
    %c0_5 = arith.constant 0 : index
    %2 = vector.load %arg1[%c0_3, %c0_4, %c0_5] : memref<1x8x256xf32, #tpu.memory_space<vmem>>, vector<1x8x256xf32>
    %3 = vector.shape_cast %2 : vector<1x8x256xf32> to vector<8x256xf32>
    %c17_i32 = arith.constant 17 : i32
    %4 = tpu.dynamic_rotate %3 by %c17_i32 dim 1 : vector<8x256xf32>, i32 -> vector<8x256xf32>
    %5 = vector.extract_strided_slice %0 {offsets = [0, 0], sizes = [1, 256], strides = [1, 1]} : vector<9x256xf32> to vector<1x256xf32>
    %6 = vector.broadcast %5 : vector<1x256xf32> to vector<8x256xf32>
    %7 = arith.mulf %4, %6 : vector<8x256xf32>
    %c16_i32 = arith.constant 16 : i32
    %8 = tpu.dynamic_rotate %3 by %c16_i32 dim 1 : vector<8x256xf32>, i32 -> vector<8x256xf32>
    %9 = vector.extract_strided_slice %0 {offsets = [1, 0], sizes = [1, 256], strides = [1, 1]} : vector<9x256xf32> to vector<1x256xf32>
    %10 = vector.broadcast %9 : vector<1x256xf32> to vector<8x256xf32>
    %11 = arith.mulf %8, %10 : vector<8x256xf32>
    %c15_i32 = arith.constant 15 : i32
    %12 = tpu.dynamic_rotate %3 by %c15_i32 dim 1 : vector<8x256xf32>, i32 -> vector<8x256xf32>
    %13 = vector.extract_strided_slice %0 {offsets = [2, 0], sizes = [1, 256], strides = [1, 1]} : vector<9x256xf32> to vector<1x256xf32>
    %14 = vector.broadcast %13 : vector<1x256xf32> to vector<8x256xf32>
    %15 = arith.mulf %12, %14 : vector<8x256xf32>
    %c1_i32 = arith.constant 1 : i32
    %16 = tpu.dynamic_rotate %3 by %c1_i32 dim 1 : vector<8x256xf32>, i32 -> vector<8x256xf32>
    %17 = vector.extract_strided_slice %0 {offsets = [3, 0], sizes = [1, 256], strides = [1, 1]} : vector<9x256xf32> to vector<1x256xf32>
    %18 = vector.broadcast %17 : vector<1x256xf32> to vector<8x256xf32>
    %19 = arith.mulf %16, %18 : vector<8x256xf32>
    %20 = vector.extract_strided_slice %0 {offsets = [4, 0], sizes = [1, 256], strides = [1, 1]} : vector<9x256xf32> to vector<1x256xf32>
    %21 = vector.broadcast %20 : vector<1x256xf32> to vector<8x256xf32>
    %22 = arith.mulf %3, %21 : vector<8x256xf32>
    %c255_i32 = arith.constant 255 : i32
    %23 = tpu.dynamic_rotate %3 by %c255_i32 dim 1 : vector<8x256xf32>, i32 -> vector<8x256xf32>
    %24 = vector.extract_strided_slice %0 {offsets = [5, 0], sizes = [1, 256], strides = [1, 1]} : vector<9x256xf32> to vector<1x256xf32>
    %25 = vector.broadcast %24 : vector<1x256xf32> to vector<8x256xf32>
    %26 = arith.mulf %23, %25 : vector<8x256xf32>
    %c241_i32 = arith.constant 241 : i32
    %27 = tpu.dynamic_rotate %3 by %c241_i32 dim 1 : vector<8x256xf32>, i32 -> vector<8x256xf32>
    %28 = vector.extract_strided_slice %0 {offsets = [6, 0], sizes = [1, 256], strides = [1, 1]} : vector<9x256xf32> to vector<1x256xf32>
    %29 = vector.broadcast %28 : vector<1x256xf32> to vector<8x256xf32>
    %30 = arith.mulf %27, %29 : vector<8x256xf32>
    %c240_i32 = arith.constant 240 : i32
    %31 = tpu.dynamic_rotate %3 by %c240_i32 dim 1 : vector<8x256xf32>, i32 -> vector<8x256xf32>
    %32 = vector.extract_strided_slice %0 {offsets = [7, 0], sizes = [1, 256], strides = [1, 1]} : vector<9x256xf32> to vector<1x256xf32>
    %33 = vector.broadcast %32 : vector<1x256xf32> to vector<8x256xf32>
    %34 = arith.mulf %31, %33 : vector<8x256xf32>
    %c239_i32 = arith.constant 239 : i32
    %35 = tpu.dynamic_rotate %3 by %c239_i32 dim 1 : vector<8x256xf32>, i32 -> vector<8x256xf32>
    %36 = vector.extract_strided_slice %0 {offsets = [8, 0], sizes = [1, 256], strides = [1, 1]} : vector<9x256xf32> to vector<1x256xf32>
    %37 = vector.broadcast %36 : vector<1x256xf32> to vector<8x256xf32>
    %38 = arith.mulf %35, %37 : vector<8x256xf32>
    %39 = tpu.concatenate %7, %11, %15, %19, %22, %26, %30, %34, %38 in 0 : vector<8x256xf32>, vector<8x256xf32>, vector<8x256xf32>, vector<8x256xf32>, vector<8x256xf32>, vector<8x256xf32>, vector<8x256xf32>, vector<8x256xf32>, vector<8x256xf32> -> vector<72x256xf32>
    %cst = arith.constant dense<0.000000e+00> : vector<8x256xf32>
    %40 = tpu.matmul %1, %39, %cst {dimension_numbers = #tpu.dot_dimension_numbers<[1], [0], [0], [1], [0, 0, 1, 1], [], []>} : vector<8x72xf32>, vector<72x256xf32>, vector<8x256xf32> -> vector<8x256xf32>
    %c0_6 = arith.constant 0 : index
    %c0_7 = arith.constant 0 : index
    %41 = vector.load %arg6[%c0_6, %c0_7] : memref<8x1xf32, #tpu.memory_space<vmem>>, vector<8x1xf32>
    %42 = vector.broadcast %41 : vector<8x1xf32> to vector<8x256xf32>
    %43 = arith.addf %40, %42 : vector<8x256xf32>
    %cst_8 = arith.constant 0.000000e+00 : f32
    %cst_9 = arith.constant 6.000000e+00 : f32
    %44 = vector.broadcast %cst_8 : f32 to vector<8x256xf32>
    %45 = arith.maximumf %44, %43 : vector<8x256xf32>
    %46 = vector.broadcast %cst_9 : f32 to vector<8x256xf32>
    %47 = arith.minimumf %46, %45 : vector<8x256xf32>
    %c17_i32_10 = arith.constant 17 : i32
    %48 = tpu.dynamic_rotate %47 by %c17_i32_10 dim 1 : vector<8x256xf32>, i32 -> vector<8x256xf32>
    %49 = vector.extract_strided_slice %0 {offsets = [0, 0], sizes = [1, 256], strides = [1, 1]} : vector<9x256xf32> to vector<1x256xf32>
    %50 = vector.broadcast %49 : vector<1x256xf32> to vector<8x256xf32>
    %51 = arith.mulf %48, %50 : vector<8x256xf32>
    %c16_i32_11 = arith.constant 16 : i32
    %52 = tpu.dynamic_rotate %47 by %c16_i32_11 dim 1 : vector<8x256xf32>, i32 -> vector<8x256xf32>
    %53 = vector.extract_strided_slice %0 {offsets = [1, 0], sizes = [1, 256], strides = [1, 1]} : vector<9x256xf32> to vector<1x256xf32>
    %54 = vector.broadcast %53 : vector<1x256xf32> to vector<8x256xf32>
    %55 = arith.mulf %52, %54 : vector<8x256xf32>
    %c15_i32_12 = arith.constant 15 : i32
    %56 = tpu.dynamic_rotate %47 by %c15_i32_12 dim 1 : vector<8x256xf32>, i32 -> vector<8x256xf32>
    %57 = vector.extract_strided_slice %0 {offsets = [2, 0], sizes = [1, 256], strides = [1, 1]} : vector<9x256xf32> to vector<1x256xf32>
    %58 = vector.broadcast %57 : vector<1x256xf32> to vector<8x256xf32>
    %59 = arith.mulf %56, %58 : vector<8x256xf32>
    %c1_i32_13 = arith.constant 1 : i32
    %60 = tpu.dynamic_rotate %47 by %c1_i32_13 dim 1 : vector<8x256xf32>, i32 -> vector<8x256xf32>
    %61 = vector.extract_strided_slice %0 {offsets = [3, 0], sizes = [1, 256], strides = [1, 1]} : vector<9x256xf32> to vector<1x256xf32>
    %62 = vector.broadcast %61 : vector<1x256xf32> to vector<8x256xf32>
    %63 = arith.mulf %60, %62 : vector<8x256xf32>
    %64 = vector.extract_strided_slice %0 {offsets = [4, 0], sizes = [1, 256], strides = [1, 1]} : vector<9x256xf32> to vector<1x256xf32>
    %65 = vector.broadcast %64 : vector<1x256xf32> to vector<8x256xf32>
    %66 = arith.mulf %47, %65 : vector<8x256xf32>
    %c255_i32_14 = arith.constant 255 : i32
    %67 = tpu.dynamic_rotate %47 by %c255_i32_14 dim 1 : vector<8x256xf32>, i32 -> vector<8x256xf32>
    %68 = vector.extract_strided_slice %0 {offsets = [5, 0], sizes = [1, 256], strides = [1, 1]} : vector<9x256xf32> to vector<1x256xf32>
    %69 = vector.broadcast %68 : vector<1x256xf32> to vector<8x256xf32>
    %70 = arith.mulf %67, %69 : vector<8x256xf32>
    %c241_i32_15 = arith.constant 241 : i32
    %71 = tpu.dynamic_rotate %47 by %c241_i32_15 dim 1 : vector<8x256xf32>, i32 -> vector<8x256xf32>
    %72 = vector.extract_strided_slice %0 {offsets = [6, 0], sizes = [1, 256], strides = [1, 1]} : vector<9x256xf32> to vector<1x256xf32>
    %73 = vector.broadcast %72 : vector<1x256xf32> to vector<8x256xf32>
    %74 = arith.mulf %71, %73 : vector<8x256xf32>
    %c240_i32_16 = arith.constant 240 : i32
    %75 = tpu.dynamic_rotate %47 by %c240_i32_16 dim 1 : vector<8x256xf32>, i32 -> vector<8x256xf32>
    %76 = vector.extract_strided_slice %0 {offsets = [7, 0], sizes = [1, 256], strides = [1, 1]} : vector<9x256xf32> to vector<1x256xf32>
    %77 = vector.broadcast %76 : vector<1x256xf32> to vector<8x256xf32>
    %78 = arith.mulf %75, %77 : vector<8x256xf32>
    %c239_i32_17 = arith.constant 239 : i32
    %79 = tpu.dynamic_rotate %47 by %c239_i32_17 dim 1 : vector<8x256xf32>, i32 -> vector<8x256xf32>
    %80 = vector.extract_strided_slice %0 {offsets = [8, 0], sizes = [1, 256], strides = [1, 1]} : vector<9x256xf32> to vector<1x256xf32>
    %81 = vector.broadcast %80 : vector<1x256xf32> to vector<8x256xf32>
    %82 = arith.mulf %79, %81 : vector<8x256xf32>
    %83 = tpu.concatenate %51, %55, %59, %63, %66, %70, %74, %78, %82 in 0 : vector<8x256xf32>, vector<8x256xf32>, vector<8x256xf32>, vector<8x256xf32>, vector<8x256xf32>, vector<8x256xf32>, vector<8x256xf32>, vector<8x256xf32>, vector<8x256xf32> -> vector<72x256xf32>
    %c0_18 = arith.constant 0 : index
    %c0_19 = arith.constant 0 : index
    %84 = vector.load %arg7[%c0_18, %c0_19] : memref<20x72xf32, #tpu.memory_space<vmem>>, vector<20x72xf32>
    %cst_20 = arith.constant dense<0.000000e+00> : vector<20x256xf32>
    %85 = tpu.matmul %84, %83, %cst_20 {dimension_numbers = #tpu.dot_dimension_numbers<[1], [0], [0], [1], [0, 0, 1, 1], [], []>} : vector<20x72xf32>, vector<72x256xf32>, vector<20x256xf32> -> vector<20x256xf32>
    %86 = vector.extract_strided_slice %85 {offsets = [0, 0], sizes = [8, 256], strides = [1, 1]} : vector<20x256xf32> to vector<8x256xf32>
    %c0_21 = arith.constant 0 : index
    %c0_22 = arith.constant 0 : index
    %87 = vector.load %arg8[%c0_21, %c0_22] : memref<8x1xf32, #tpu.memory_space<vmem>>, vector<8x1xf32>
    %88 = vector.broadcast %87 : vector<8x1xf32> to vector<8x256xf32>
    %89 = arith.addf %86, %88 : vector<8x256xf32>
    %cst_23 = arith.constant 0.000000e+00 : f32
    %cst_24 = arith.constant 6.000000e+00 : f32
    %90 = vector.broadcast %cst_23 : f32 to vector<8x256xf32>
    %91 = arith.maximumf %90, %89 : vector<8x256xf32>
    %92 = vector.broadcast %cst_24 : f32 to vector<8x256xf32>
    %93 = arith.minimumf %92, %91 : vector<8x256xf32>
    %94 = vector.extract_strided_slice %85 {offsets = [8, 0], sizes = [4, 256], strides = [1, 1]} : vector<20x256xf32> to vector<4x256xf32>
    %c0_25 = arith.constant 0 : index
    %c0_26 = arith.constant 0 : index
    %95 = vector.load %arg9[%c0_25, %c0_26] : memref<4x1xf32, #tpu.memory_space<vmem>>, vector<4x1xf32>
    %96 = vector.broadcast %95 : vector<4x1xf32> to vector<4x256xf32>
    %97 = arith.addf %94, %96 : vector<4x256xf32>
    %cst_27 = arith.constant 0.000000e+00 : f32
    %cst_28 = arith.constant 6.000000e+00 : f32
    %98 = vector.broadcast %cst_27 : f32 to vector<4x256xf32>
    %99 = arith.maximumf %98, %97 : vector<4x256xf32>
    %100 = vector.broadcast %cst_28 : f32 to vector<4x256xf32>
    %101 = arith.minimumf %100, %99 : vector<4x256xf32>
    %102 = vector.extract_strided_slice %85 {offsets = [12, 0], sizes = [8, 256], strides = [1, 1]} : vector<20x256xf32> to vector<8x256xf32>
    %c0_29 = arith.constant 0 : index
    %c0_30 = arith.constant 0 : index
    %c0_31 = arith.constant 0 : index
    %103 = vector.load %arg3[%c0_29, %c0_30, %c0_31] : memref<1x4x8xf32, #tpu.memory_space<vmem>>, vector<1x4x8xf32>
    %104 = vector.shape_cast %103 : vector<1x4x8xf32> to vector<4x8xf32>
    %c0_32 = arith.constant 0 : index
    %c0_33 = arith.constant 0 : index
    %105 = vector.load %arg10[%c0_32, %c0_33] : memref<8x4xf32, #tpu.memory_space<vmem>>, vector<8x4xf32>
    %cst_34 = arith.constant dense<0.000000e+00> : vector<4x4xf32>
    %106 = tpu.matmul %104, %105, %cst_34 {dimension_numbers = #tpu.dot_dimension_numbers<[1], [0], [0], [1], [0, 0, 1, 1], [], []>} : vector<4x8xf32>, vector<8x4xf32>, vector<4x4xf32> -> vector<4x4xf32>
    %c0_35 = arith.constant 0 : index
    %c0_36 = arith.constant 0 : index
    %107 = vector.load %arg11[%c0_35, %c0_36] : memref<1x4xf32, #tpu.memory_space<vmem>>, vector<1x4xf32>
    %108 = vector.broadcast %107 : vector<1x4xf32> to vector<4x4xf32>
    %109 = arith.addf %106, %108 : vector<4x4xf32>
    %cst_37 = arith.constant 0.000000e+00 : f32
    %cst_38 = arith.constant 6.000000e+00 : f32
    %110 = vector.broadcast %cst_37 : f32 to vector<4x4xf32>
    %111 = arith.maximumf %110, %109 : vector<4x4xf32>
    %112 = vector.broadcast %cst_38 : f32 to vector<4x4xf32>
    %113 = arith.minimumf %112, %111 : vector<4x4xf32>
    %c0_39 = arith.constant 0 : index
    %c0_40 = arith.constant 0 : index
    %114 = vector.load %arg12[%c0_39, %c0_40] : memref<4x8xf32, #tpu.memory_space<vmem>>, vector<4x8xf32>
    %c0_41 = arith.constant 0 : index
    %c0_42 = arith.constant 0 : index
    %c0_43 = arith.constant 0 : index
    %115 = vector.load %arg2[%c0_41, %c0_42, %c0_43] : memref<1x8x4xf32, #tpu.memory_space<vmem>>, vector<1x8x4xf32>
    %116 = vector.shape_cast %115 : vector<1x8x4xf32> to vector<8x4xf32>
    %cst_44 = arith.constant dense<0.000000e+00> : vector<4x4xf32>
    %117 = tpu.matmul %114, %116, %cst_44 {dimension_numbers = #tpu.dot_dimension_numbers<[1], [0], [0], [1], [0, 0, 1, 1], [], []>} : vector<4x8xf32>, vector<8x4xf32>, vector<4x4xf32> -> vector<4x4xf32>
    %c0_45 = arith.constant 0 : index
    %c0_46 = arith.constant 0 : index
    %118 = vector.load %arg13[%c0_45, %c0_46] : memref<4x1xf32, #tpu.memory_space<vmem>>, vector<4x1xf32>
    %119 = vector.broadcast %118 : vector<4x1xf32> to vector<4x4xf32>
    %120 = arith.addf %117, %119 : vector<4x4xf32>
    %cst_47 = arith.constant 0.000000e+00 : f32
    %cst_48 = arith.constant 6.000000e+00 : f32
    %121 = vector.broadcast %cst_47 : f32 to vector<4x4xf32>
    %122 = arith.maximumf %121, %120 : vector<4x4xf32>
    %123 = vector.broadcast %cst_48 : f32 to vector<4x4xf32>
    %124 = arith.minimumf %123, %122 : vector<4x4xf32>
    %cst_49 = arith.constant dense<0.000000e+00> : vector<4x256xf32>
    %125 = tpu.matmul %113, %101, %cst_49 {dimension_numbers = #tpu.dot_dimension_numbers<[1], [0], [0], [1], [0, 0, 1, 1], [], []>} : vector<4x4xf32>, vector<4x256xf32>, vector<4x256xf32> -> vector<4x256xf32>
    %cst_50 = arith.constant 5.000000e-01 : f32
    %126 = vector.broadcast %cst_50 : f32 to vector<4x256xf32>
    %127 = arith.mulf %125, %126 : vector<4x256xf32>
    %cst_51 = arith.constant dense<0xFF800000> : vector<4xf32>
    %128 = vector.multi_reduction <maximumf>, %127, %cst_51 [1] : vector<4x256xf32> to vector<4xf32>
    %129 = vector.shape_cast %128 : vector<4xf32> to vector<4x1xf32>
    %130 = vector.broadcast %129 : vector<4x1xf32> to vector<4x256xf32>
    %131 = arith.subf %127, %130 : vector<4x256xf32>
    %132 = math.exp %131 : vector<4x256xf32>
    %cst_52 = arith.constant dense<0.000000e+00> : vector<4xf32>
    %133 = vector.multi_reduction <add>, %132, %cst_52 [1] : vector<4x256xf32> to vector<4xf32>
    %134 = vector.shape_cast %133 : vector<4xf32> to vector<4x1xf32>
    %135 = tpu.reciprocal %134 {approx = true} : vector<4x1xf32> -> vector<4x1xf32>
    %136 = vector.broadcast %135 : vector<4x1xf32> to vector<4x256xf32>
    %137 = arith.mulf %132, %136 : vector<4x256xf32>
    %cst_53 = arith.constant dense<0.000000e+00> : vector<4x256xf32>
    %138 = tpu.matmul %124, %137, %cst_53 {dimension_numbers = #tpu.dot_dimension_numbers<[1], [0], [0], [1], [0, 0, 1, 1], [], []>} : vector<4x4xf32>, vector<4x256xf32>, vector<4x256xf32> -> vector<4x256xf32>
    %c0_54 = arith.constant 0 : index
    %c0_55 = arith.constant 0 : index
    %139 = vector.load %arg14[%c0_54, %c0_55] : memref<8x4xf32, #tpu.memory_space<vmem>>, vector<8x4xf32>
    %cst_56 = arith.constant dense<0.000000e+00> : vector<8x256xf32>
    %140 = tpu.matmul %139, %138, %cst_56 {dimension_numbers = #tpu.dot_dimension_numbers<[1], [0], [0], [1], [0, 0, 1, 1], [], []>} : vector<8x4xf32>, vector<4x256xf32>, vector<8x256xf32> -> vector<8x256xf32>
    %c0_57 = arith.constant 0 : index
    %c0_58 = arith.constant 0 : index
    %141 = vector.load %arg15[%c0_57, %c0_58] : memref<8x1xf32, #tpu.memory_space<vmem>>, vector<8x1xf32>
    %142 = vector.broadcast %141 : vector<8x1xf32> to vector<8x256xf32>
    %143 = arith.addf %140, %142 : vector<8x256xf32>
    %cst_59 = arith.constant 0.000000e+00 : f32
    %cst_60 = arith.constant 6.000000e+00 : f32
    %144 = vector.broadcast %cst_59 : f32 to vector<8x256xf32>
    %145 = arith.maximumf %144, %143 : vector<8x256xf32>
    %146 = vector.broadcast %cst_60 : f32 to vector<8x256xf32>
    %147 = arith.minimumf %146, %145 : vector<8x256xf32>
    %c0_61 = arith.constant 0 : index
    %c0_62 = arith.constant 0 : index
    %148 = vector.load %arg16[%c0_61, %c0_62] : memref<8x72xf32, #tpu.memory_space<vmem>>, vector<8x72xf32>
    %c17_i32_63 = arith.constant 17 : i32
    %149 = tpu.dynamic_rotate %147 by %c17_i32_63 dim 1 : vector<8x256xf32>, i32 -> vector<8x256xf32>
    %150 = vector.extract_strided_slice %0 {offsets = [0, 0], sizes = [1, 256], strides = [1, 1]} : vector<9x256xf32> to vector<1x256xf32>
    %151 = vector.broadcast %150 : vector<1x256xf32> to vector<8x256xf32>
    %152 = arith.mulf %149, %151 : vector<8x256xf32>
    %c16_i32_64 = arith.constant 16 : i32
    %153 = tpu.dynamic_rotate %147 by %c16_i32_64 dim 1 : vector<8x256xf32>, i32 -> vector<8x256xf32>
    %154 = vector.extract_strided_slice %0 {offsets = [1, 0], sizes = [1, 256], strides = [1, 1]} : vector<9x256xf32> to vector<1x256xf32>
    %155 = vector.broadcast %154 : vector<1x256xf32> to vector<8x256xf32>
    %156 = arith.mulf %153, %155 : vector<8x256xf32>
    %c15_i32_65 = arith.constant 15 : i32
    %157 = tpu.dynamic_rotate %147 by %c15_i32_65 dim 1 : vector<8x256xf32>, i32 -> vector<8x256xf32>
    %158 = vector.extract_strided_slice %0 {offsets = [2, 0], sizes = [1, 256], strides = [1, 1]} : vector<9x256xf32> to vector<1x256xf32>
    %159 = vector.broadcast %158 : vector<1x256xf32> to vector<8x256xf32>
    %160 = arith.mulf %157, %159 : vector<8x256xf32>
    %c1_i32_66 = arith.constant 1 : i32
    %161 = tpu.dynamic_rotate %147 by %c1_i32_66 dim 1 : vector<8x256xf32>, i32 -> vector<8x256xf32>
    %162 = vector.extract_strided_slice %0 {offsets = [3, 0], sizes = [1, 256], strides = [1, 1]} : vector<9x256xf32> to vector<1x256xf32>
    %163 = vector.broadcast %162 : vector<1x256xf32> to vector<8x256xf32>
    %164 = arith.mulf %161, %163 : vector<8x256xf32>
    %165 = vector.extract_strided_slice %0 {offsets = [4, 0], sizes = [1, 256], strides = [1, 1]} : vector<9x256xf32> to vector<1x256xf32>
    %166 = vector.broadcast %165 : vector<1x256xf32> to vector<8x256xf32>
    %167 = arith.mulf %147, %166 : vector<8x256xf32>
    %c255_i32_67 = arith.constant 255 : i32
    %168 = tpu.dynamic_rotate %147 by %c255_i32_67 dim 1 : vector<8x256xf32>, i32 -> vector<8x256xf32>
    %169 = vector.extract_strided_slice %0 {offsets = [5, 0], sizes = [1, 256], strides = [1, 1]} : vector<9x256xf32> to vector<1x256xf32>
    %170 = vector.broadcast %169 : vector<1x256xf32> to vector<8x256xf32>
    %171 = arith.mulf %168, %170 : vector<8x256xf32>
    %c241_i32_68 = arith.constant 241 : i32
    %172 = tpu.dynamic_rotate %147 by %c241_i32_68 dim 1 : vector<8x256xf32>, i32 -> vector<8x256xf32>
    %173 = vector.extract_strided_slice %0 {offsets = [6, 0], sizes = [1, 256], strides = [1, 1]} : vector<9x256xf32> to vector<1x256xf32>
    %174 = vector.broadcast %173 : vector<1x256xf32> to vector<8x256xf32>
    %175 = arith.mulf %172, %174 : vector<8x256xf32>
    %c240_i32_69 = arith.constant 240 : i32
    %176 = tpu.dynamic_rotate %147 by %c240_i32_69 dim 1 : vector<8x256xf32>, i32 -> vector<8x256xf32>
    %177 = vector.extract_strided_slice %0 {offsets = [7, 0], sizes = [1, 256], strides = [1, 1]} : vector<9x256xf32> to vector<1x256xf32>
    %178 = vector.broadcast %177 : vector<1x256xf32> to vector<8x256xf32>
    %179 = arith.mulf %176, %178 : vector<8x256xf32>
    %c239_i32_70 = arith.constant 239 : i32
    %180 = tpu.dynamic_rotate %147 by %c239_i32_70 dim 1 : vector<8x256xf32>, i32 -> vector<8x256xf32>
    %181 = vector.extract_strided_slice %0 {offsets = [8, 0], sizes = [1, 256], strides = [1, 1]} : vector<9x256xf32> to vector<1x256xf32>
    %182 = vector.broadcast %181 : vector<1x256xf32> to vector<8x256xf32>
    %183 = arith.mulf %180, %182 : vector<8x256xf32>
    %184 = tpu.concatenate %152, %156, %160, %164, %167, %171, %175, %179, %183 in 0 : vector<8x256xf32>, vector<8x256xf32>, vector<8x256xf32>, vector<8x256xf32>, vector<8x256xf32>, vector<8x256xf32>, vector<8x256xf32>, vector<8x256xf32>, vector<8x256xf32> -> vector<72x256xf32>
    %cst_71 = arith.constant dense<0.000000e+00> : vector<8x256xf32>
    %185 = tpu.matmul %148, %184, %cst_71 {dimension_numbers = #tpu.dot_dimension_numbers<[1], [0], [0], [1], [0, 0, 1, 1], [], []>} : vector<8x72xf32>, vector<72x256xf32>, vector<8x256xf32> -> vector<8x256xf32>
    %186 = arith.addf %102, %185 : vector<8x256xf32>
    %c0_72 = arith.constant 0 : index
    %c0_73 = arith.constant 0 : index
    %187 = vector.load %arg17[%c0_72, %c0_73] : memref<8x1xf32, #tpu.memory_space<vmem>>, vector<8x1xf32>
    %188 = vector.broadcast %187 : vector<8x1xf32> to vector<8x256xf32>
    %189 = arith.addf %186, %188 : vector<8x256xf32>
    %cst_74 = arith.constant 0.000000e+00 : f32
    %cst_75 = arith.constant 6.000000e+00 : f32
    %190 = vector.broadcast %cst_74 : f32 to vector<8x256xf32>
    %191 = arith.maximumf %190, %189 : vector<8x256xf32>
    %192 = vector.broadcast %cst_75 : f32 to vector<8x256xf32>
    %193 = arith.minimumf %192, %191 : vector<8x256xf32>
    %c0_76 = arith.constant 0 : index
    %c0_77 = arith.constant 0 : index
    %194 = vector.load %arg18[%c0_76, %c0_77] : memref<8x8xf32, #tpu.memory_space<vmem>>, vector<8x8xf32>
    %cst_78 = arith.constant dense<0.000000e+00> : vector<8x256xf32>
    %195 = tpu.matmul %194, %193, %cst_78 {dimension_numbers = #tpu.dot_dimension_numbers<[1], [0], [0], [1], [0, 0, 1, 1], [], []>} : vector<8x8xf32>, vector<8x256xf32>, vector<8x256xf32> -> vector<8x256xf32>
    %c0_79 = arith.constant 0 : index
    %c0_80 = arith.constant 0 : index
    %196 = vector.load %arg19[%c0_79, %c0_80] : memref<8x8xf32, #tpu.memory_space<vmem>>, vector<8x8xf32>
    %cst_81 = arith.constant dense<0.000000e+00> : vector<8x256xf32>
    %197 = tpu.matmul %196, %93, %cst_81 {dimension_numbers = #tpu.dot_dimension_numbers<[1], [0], [0], [1], [0, 0, 1, 1], [], []>} : vector<8x8xf32>, vector<8x256xf32>, vector<8x256xf32> -> vector<8x256xf32>
    %198 = arith.addf %195, %197 : vector<8x256xf32>
    %c0_82 = arith.constant 0 : index
    %c0_83 = arith.constant 0 : index
    %199 = vector.load %arg20[%c0_82, %c0_83] : memref<8x1xf32, #tpu.memory_space<vmem>>, vector<8x1xf32>
    %200 = vector.broadcast %199 : vector<8x1xf32> to vector<8x256xf32>
    %201 = arith.addf %198, %200 : vector<8x256xf32>
    %cst_84 = arith.constant 0.000000e+00 : f32
    %cst_85 = arith.constant 6.000000e+00 : f32
    %202 = vector.broadcast %cst_84 : f32 to vector<8x256xf32>
    %203 = arith.maximumf %202, %201 : vector<8x256xf32>
    %204 = vector.broadcast %cst_85 : f32 to vector<8x256xf32>
    %205 = arith.minimumf %204, %203 : vector<8x256xf32>
    %c0_86 = arith.constant 0 : index
    %c0_87 = arith.constant 0 : index
    %c0_88 = arith.constant 0 : index
    %206 = vector.load %arg21[%c0_86, %c0_87, %c0_88] : memref<1x8x256xf32, #tpu.memory_space<vmem>>, vector<1x8x256xf32>
    %207 = vector.shape_cast %206 : vector<1x8x256xf32> to vector<8x256xf32>
    %208 = vector.shape_cast %205 : vector<8x256xf32> to vector<1x8x256xf32>
    tpu.vector_store %arg21[%c0_86, %c0_87, %c0_88], %208 {strides = array<i32>} : memref<1x8x256xf32, #tpu.memory_space<vmem>>, vector<1x8x256xf32>,
    return
  }
  func.func @transform_0(%arg0: i32) -> (i32, i32, i32) {
    %c0_i32 = arith.constant 0 : i32
    %c0_i32_0 = arith.constant 0 : i32
    %c0_i32_1 = arith.constant 0 : i32
    return %arg0, %c0_i32, %c0_i32_0 : i32, i32, i32
  }
  func.func @transform_1(%arg0: i32) -> (i32, i32, i32) {
    %c0_i32 = arith.constant 0 : i32
    %c0_i32_0 = arith.constant 0 : i32
    %c0_i32_1 = arith.constant 0 : i32
    return %arg0, %c0_i32, %c0_i32_0 : i32, i32, i32
  }
  func.func @transform_2(%arg0: i32) -> (i32, i32, i32) {
    %c0_i32 = arith.constant 0 : i32
    %c0_i32_0 = arith.constant 0 : i32
    %c0_i32_1 = arith.constant 0 : i32
    return %arg0, %c0_i32, %c0_i32_0 : i32, i32, i32
  }
  func.func @transform_3(%arg0: i32) -> (i32, i32) {
    %c0_i32 = arith.constant 0 : i32
    %c0_i32_0 = arith.constant 0 : i32
    %c0_i32_1 = arith.constant 0 : i32
    return %c0_i32, %c0_i32_0 : i32, i32
  }
  func.func @transform_4(%arg0: i32) -> (i32, i32) {
    %c0_i32 = arith.constant 0 : i32
    %c0_i32_0 = arith.constant 0 : i32
    %c0_i32_1 = arith.constant 0 : i32
    return %c0_i32, %c0_i32_0 : i32, i32
  }
  func.func @transform_5(%arg0: i32) -> (i32, i32) {
    %c0_i32 = arith.constant 0 : i32
    %c0_i32_0 = arith.constant 0 : i32
    %c0_i32_1 = arith.constant 0 : i32
    return %c0_i32, %c0_i32_0 : i32, i32
  }
  func.func @transform_6(%arg0: i32) -> (i32, i32) {
    %c0_i32 = arith.constant 0 : i32
    %c0_i32_0 = arith.constant 0 : i32
    %c0_i32_1 = arith.constant 0 : i32
    return %c0_i32, %c0_i32_0 : i32, i32
  }
  func.func @transform_7(%arg0: i32) -> (i32, i32) {
    %c0_i32 = arith.constant 0 : i32
    %c0_i32_0 = arith.constant 0 : i32
    %c0_i32_1 = arith.constant 0 : i32
    return %c0_i32, %c0_i32_0 : i32, i32
  }
  func.func @transform_8(%arg0: i32) -> (i32, i32) {
    %c0_i32 = arith.constant 0 : i32
    %c0_i32_0 = arith.constant 0 : i32
    %c0_i32_1 = arith.constant 0 : i32
    return %c0_i32, %c0_i32_0 : i32, i32
  }
  func.func @transform_9(%arg0: i32) -> (i32, i32) {
    %c0_i32 = arith.constant 0 : i32
    %c0_i32_0 = arith.constant 0 : i32
    %c0_i32_1 = arith.constant 0 : i32
    return %c0_i32, %c0_i32_0 : i32, i32
  }
  func.func @transform_10(%arg0: i32) -> (i32, i32) {
    %c0_i32 = arith.constant 0 : i32
    %c0_i32_0 = arith.constant 0 : i32
    %c0_i32_1 = arith.constant 0 : i32
    return %c0_i32, %c0_i32_0 : i32, i32
  }
  func.func @transform_11(%arg0: i32) -> (i32, i32) {
    %c0_i32 = arith.constant 0 : i32
    %c0_i32_0 = arith.constant 0 : i32
    %c0_i32_1 = arith.constant 0 : i32
    return %c0_i32, %c0_i32_0 : i32, i32
  }
  func.func @transform_12(%arg0: i32) -> (i32, i32) {
    %c0_i32 = arith.constant 0 : i32
    %c0_i32_0 = arith.constant 0 : i32
    %c0_i32_1 = arith.constant 0 : i32
    return %c0_i32, %c0_i32_0 : i32, i32
  }
  func.func @transform_13(%arg0: i32) -> (i32, i32) {
    %c0_i32 = arith.constant 0 : i32
    %c0_i32_0 = arith.constant 0 : i32
    %c0_i32_1 = arith.constant 0 : i32
    return %c0_i32, %c0_i32_0 : i32, i32
  }
  func.func @transform_14(%arg0: i32) -> (i32, i32) {
    %c0_i32 = arith.constant 0 : i32
    %c0_i32_0 = arith.constant 0 : i32
    %c0_i32_1 = arith.constant 0 : i32
    return %c0_i32, %c0_i32_0 : i32, i32
  }
  func.func @transform_15(%arg0: i32) -> (i32, i32) {
    %c0_i32 = arith.constant 0 : i32
    %c0_i32_0 = arith.constant 0 : i32
    %c0_i32_1 = arith.constant 0 : i32
    return %c0_i32, %c0_i32_0 : i32, i32
  }
  func.func @transform_16(%arg0: i32) -> (i32, i32) {
    %c0_i32 = arith.constant 0 : i32
    %c0_i32_0 = arith.constant 0 : i32
    %c0_i32_1 = arith.constant 0 : i32
    return %c0_i32, %c0_i32_0 : i32, i32
  }
  func.func @transform_17(%arg0: i32) -> (i32, i32) {
    %c0_i32 = arith.constant 0 : i32
    %c0_i32_0 = arith.constant 0 : i32
    %c0_i32_1 = arith.constant 0 : i32
    return %c0_i32, %c0_i32_0 : i32, i32
  }
  func.func @transform_18(%arg0: i32) -> (i32, i32) {
    %c0_i32 = arith.constant 0 : i32
    %c0_i32_0 = arith.constant 0 : i32
    %c0_i32_1 = arith.constant 0 : i32
    return %c0_i32, %c0_i32_0 : i32, i32
  }
  func.func @transform_19(%arg0: i32) -> (i32, i32) {
    %c0_i32 = arith.constant 0 : i32
    %c0_i32_0 = arith.constant 0 : i32
    %c0_i32_1 = arith.constant 0 : i32
    return %c0_i32, %c0_i32_0 : i32, i32
  }
  func.func @transform_20(%arg0: i32) -> (i32, i32, i32) {
    %c0_i32 = arith.constant 0 : i32
    %c0_i32_0 = arith.constant 0 : i32
    %c0_i32_1 = arith.constant 0 : i32
    return %arg0, %c0_i32, %c0_i32_0 : i32, i32, i32
  }
}

</mosaic_0001>

<bundles_post_ra>
// kernel: attention_forward.2
= control target key start
LH: loop header
LB: loop body
LE: loop exit
PB: predicated region body
PF: predicated region fallthrough
CT: control target
= control target key end

     0   :  { %s854_s27 = smov 0   ;;  %s1129_s0 = inlined_call_operand.vmem [shape: f32[2,8,256], index: 0, kind: input, shape index: {}]   ;;  %s1130_s1 = inlined_call_operand.vmem [shape: f32[2,8,256], index: 1, kind: input, shape index: {}]   ;;  %s1131_s2 = inlined_call_operand.vmem [shape: f32[256,16], index: 2, kind: input, shape index: {}]   ;;  %s1132_s3 = inlined_call_operand.vmem [shape: f32[16,256], index: 3, kind: input, shape index: {}]   ;;  %s1133_s4 = inlined_call_operand.vmem [shape: f32[256,16], index: 4, kind: input, shape index: {}]   ;;  %s1134_s5 = inlined_call_operand.vmem [shape: f32[16,256], index: 5, kind: input, shape index: {}]   ;;  %s1135_s6 = inlined_call_operand.vmem [shape: f32[2,8,1], index: 6, kind: output, shape index: {0}]   ;;  %s1136_s7 = inlined_call_operand.vmem [shape: f32[2,8,1], index: 7, kind: output, shape index: {1}]   ;;  %s1137_s8 = inlined_call_operand.vmem [shape: f32[2,8,256], index: 8, kind: output, shape index: {2}]  }
   0x1 LB: > { %s761_s28 = sadd.s32 4294967295, %s806_s27   ;;  %p765_p0 = scmp.ge.s32.totalorder %s806_s27, 1  ;;  %s806_s27 = sphi %s854_s27, %s19_s27  }
   0x2   : > { %p277_p1 = scmp.lt.s32.totalorder %s806_s27, 3 }
   0x4   : > { %p278_p2 = pnand %p765_p0, %p277_p1 }
   0x5   : > { %p324_p3 = scmp.lt.s32.totalorder (!%p278_p2), %s761_s28, 1 }
   0x6   : > { %281 = sbr.rel (%p278_p2) target bundleno = 705 (0x2c1), region = 44 }
   0xb   : > { %v385_v0 = vld [vmem:[%s1131_s2 + $0x78] sm:$0xff]  ;;  %v384_v2 = vld [vmem:[%s1131_s2 + $0x70] sm:$0xff]  ;;  %v383_v4 = vld [vmem:[%s1131_s2 + $0x68] sm:$0xff]  ;;  %s1139_s28 = smov (!%p324_p3, %s761_s28), 1  ;;  %vm446_vm0 = vcmask 130048   ;;  %vm364_vm2 = vcmask 7168  }
   0xc   : > { %v401_v1 = vld [vmem:[%s1131_s2 + $0xf8] sm:$0xff]  ;;  %402 = vmatpush.msra.mxu0 %v385_v0  ;;  %v400_v3 = vld [vmem:[%s1131_s2 + $0xf0] sm:$0xff]  ;;  %v399_v5 = vld [vmem:[%s1131_s2 + $0xe8] sm:$0xff]  ;;  %s959_s29 = sshll.u32 %s1139_s28, 4  ;;  %s770_s24 = sshll.u32 %s1139_s28, 3 }
   0xd   : > { %422 = vmatpush.msra.mxu1 %v401_v1  ;;  %v382_v6 = vld [vmem:[%s1131_s2 + $0x60] sm:$0xff]  ;;  %v381_v8 = vld [vmem:[%s1131_s2 + $0x58] sm:$0xff]  ;;  %v380_v10 = vld [vmem:[%s1131_s2 + $0x50] sm:$0xff]  ;;  %s328_s18 = scalar_lea.vmem %s1129_s0, %s959_s29  ;;  %s333_s21 = scalar_lea.vmem %s1130_s1, %s959_s29 }
   0xe   : > { %403 = vmatpush.msra.mxu0 %v384_v2  ;;  %v398_v7 = vld [vmem:[%s1131_s2 + $0xe0] sm:$0xff]  ;;  %v397_v9 = vld [vmem:[%s1131_s2 + $0xd8] sm:$0xff]  ;;  %v396_v11 = vld [vmem:[%s1131_s2 + $0xd0] sm:$0xff]  ;;  %s337_s30 = scalar_lea.vmem %s1135_s6, %s770_s24  ;;  %s346_s11 = scalar_lea.vmem %s1137_s8, %s959_s29 }
   0xf   : > { %423 = vmatpush.msra.mxu1 %v400_v3  ;;  %v379_v12 = vld [vmem:[%s1131_s2 + $0x48] sm:$0xff]  ;;  %v378_v14 = vld [vmem:[%s1131_s2 + $0x40] sm:$0xff]  ;;  %v444_v16 = vld [vmem:[%s1132_s3 + $0x10] sm:$0xff] }
  0x10   : > { %404 = vmatpush.msra.mxu0 %v383_v4  ;;  %v395_v13 = vld [vmem:[%s1131_s2 + $0xc8] sm:$0xff]  ;;  %v394_v15 = vld [vmem:[%s1131_s2 + $0xc0] sm:$0xff]  ;;  %v445_v17 = vld [vmem:[%s1132_s3 + $0x18] sm:$0xff]  ;;  %464 = vmatpush.msra.mxu2 %v444_v16 }
  0x11   : > { %424 = vmatpush.msra.mxu1 %v399_v5  ;;  %v442_v18 = vld [vmem:[%s1132_s3] sm:$0xff]  ;;  %v443_v19 = vld [vmem:[%s1132_s3 + $0x8] sm:$0xff]  ;;  %v377_v20 = vld [vmem:[%s1131_s2 + $0x38] sm:$0xff]  ;;  %484 = vmatpush.msra.mxu3 %v445_v17 }
  0x12   : > { %405 = vmatpush.msra.mxu0 %v382_v6  ;;  %v393_v21 = vld [vmem:[%s1131_s2 + $0xb8] sm:$0xff]  ;;  %v376_v24 = vld [vmem:[%s1131_s2 + $0x30] sm:$0xff]  ;;  %465 = vmatpush.msra.mxu2 %v442_v18  ;;  %v375_v28 = vld [vmem:[%s1131_s2 + $0x28] sm:$0xff] }
  0x13   : > { %425 = vmatpush.msra.mxu1 %v398_v7  ;;  %v505_v22 = vld [vmem:[%s1133_s4 + $0x78] sm:$0xff]  ;;  %v392_v25 = vld [vmem:[%s1131_s2 + $0xb0] sm:$0xff]  ;;  %485 = vmatpush.msra.mxu3 %v443_v19  ;;  %v391_v29 = vld [vmem:[%s1131_s2 + $0xa8] sm:$0xff] }
  0x14   : > { %406 = vmatpush.msra.mxu0 %v381_v8  ;;  %v521_v23 = vld [vmem:[%s1133_s4 + $0xf8] sm:$0xff]  ;;  %v504_v26 = vld [vmem:[%s1133_s4 + $0x70] sm:$0xff]  ;;  %522 = vmatpush.msrb.mxu2 %v505_v22  ;;  %v503_v30 = vld [vmem:[%s1133_s4 + $0x68] sm:$0xff] }
  0x15   : > { %426 = vmatpush.msra.mxu1 %v397_v9  ;;  %v520_v27 = vld [vmem:[%s1133_s4 + $0xf0] sm:$0xff]  ;;  %542 = vmatpush.msrb.mxu3 %v521_v23  ;;  %v519_v31 = vld [vmem:[%s1133_s4 + $0xe8] sm:$0xff]  ;;  %v374_v32 = vld [vmem:[%s1131_s2 + $0x20] sm:$0xff] }
  0x16   : > { %407 = vmatpush.msra.mxu0 %v380_v10  ;;  %v390_v33 = vld [vmem:[%s1131_s2 + $0xa0] sm:$0xff]  ;;  %523 = vmatpush.msrb.mxu2 %v504_v26  ;;  %v373_v36 = vld [vmem:[%s1131_s2 + $0x18] sm:$0xff]  ;;  %v372_v38 = vld [vmem:[%s1131_s2 + $0x10] sm:$0xff] }
  0x17   : > { %427 = vmatpush.msra.mxu1 %v396_v11  ;;  %543 = vmatpush.msrb.mxu3 %v520_v27  ;;  %v502_v34 = vld [vmem:[%s1133_s4 + $0x60] sm:$0xff]  ;;  %v389_v37 = vld [vmem:[%s1131_s2 + $0x98] sm:$0xff]  ;;  %v388_v39 = vld [vmem:[%s1131_s2 + $0x90] sm:$0xff] }
  0x18   : > { %408 = vmatpush.msra.mxu0 %v379_v12  ;;  %v518_v35 = vld [vmem:[%s1133_s4 + $0xe0] sm:$0xff]  ;;  %524 = vmatpush.msrb.mxu2 %v503_v30  ;;  %v501_v40 = vld [vmem:[%s1133_s4 + $0x58] sm:$0xff]  ;;  %v348_v44 = vld [vmem:[%s328_s18 + $0x8] sm:$0xff] }
  0x19   : > { %428 = vmatpush.msra.mxu1 %v395_v13  ;;  %544 = vmatpush.msrb.mxu3 %v519_v31  ;;  %v517_v41 = vld [vmem:[%s1133_s4 + $0xd8] sm:$0xff]  ;;  %v347_v42 = vld [vmem:[%s328_s18] sm:$0xff]  ;;  %v350_v45 = vld [vmem:[%s333_s21 + $0x8] sm:$0xff] }
  0x1a   : > { %409 = vmatpush.msra.mxu0 %v378_v14  ;;  %v349_v43 = vld [vmem:[%s333_s21] sm:$0xff]  ;;  %525 = vmatpush.msrb.mxu2 %v502_v34  ;;  %v500_v46 = vld [vmem:[%s1133_s4 + $0x50] sm:$0xff]  ;;  %v371_v48 = vld [vmem:[%s1131_s2 + $0x8] sm:$0xff]  ;;  %v1031_v55 = vadd.f32 %v350_v45, %v348_v44  ;;  %s341_s21 = scalar_lea.vmem %s1136_s7, %s770_s24 }
  0x1b   : > { %429 = vmatpush.msra.mxu1 %v394_v15  ;;  %545 = vmatpush.msrb.mxu3 %v518_v35  ;;  %v516_v47 = vld [vmem:[%s1133_s4 + $0xd0] sm:$0xff]  ;;  %v387_v49 = vld [vmem:[%s1131_s2 + $0x88] sm:$0xff]  ;;  %v370_v52 = vld [vmem:[%s1131_s2] sm:$0xff]  ;;  %v1029_v54 = vadd.f32 %v349_v43, %v347_v42 }
  0x1c   : > { %410 = vmatpush.msra.mxu0 %v377_v20  ;;  %526 = vmatpush.msrb.mxu2 %v501_v40  ;;  %v499_v50 = vld [vmem:[%s1133_s4 + $0x48] sm:$0xff]  ;;  %v386_v53 = vld [vmem:[%s1131_s2 + $0x80] sm:$0xff]  ;;  %v497_v58 = vld [vmem:[%s1133_s4 + $0x38] sm:$0xff] }
  0x1d   : > { %430 = vmatpush.msra.mxu1 %v393_v21  ;;  %546 = vmatpush.msrb.mxu3 %v517_v41  ;;  %v515_v51 = vld [vmem:[%s1133_s4 + $0xc8] sm:$0xff]  ;;  %v498_v56 = vld [vmem:[%s1133_s4 + $0x40] sm:$0xff]  ;;  %v513_v59 = vld [vmem:[%s1133_s4 + $0xb8] sm:$0xff]  ;;  %v353_v27 = vadd.f32 %v1031_v55, %v1029_v54 }
  0x1e   : > { %411 = vmatpush.msra.mxu0 %v376_v24  ;;  %527 = vmatpush.msrb.mxu2 %v500_v46  ;;  %v514_v57 = vld [vmem:[%s1133_s4 + $0xc0] sm:$0xff]  ;;  %v496_v60 = vld [vmem:[%s1133_s4 + $0x30] sm:$0xff]  ;;  %v495_v62 = vld [vmem:[%s1133_s4 + $0x28] sm:$0xff] }
  0x1f   : > { %431 = vmatpush.msra.mxu1 %v392_v25  ;;  %547 = vmatpush.msrb.mxu3 %v516_v47  ;;  %v512_v61 = vld [vmem:[%s1133_s4 + $0xb0] sm:$0xff]  ;;  %v511_v63 = vld [vmem:[%s1133_s4 + $0xa8] sm:$0xff]  ;;  %v494_v0 = vld [vmem:[%s1133_s4 + $0x20] sm:$0xff] }
  0x20   : > { %412 = vmatpush.msra.mxu0 %v375_v28  ;;  %528 = vmatpush.msrb.mxu2 %v499_v50  ;;  %v510_v1 = vld [vmem:[%s1133_s4 + $0xa0] sm:$0xff]  ;;  %v493_v2 = vld [vmem:[%s1133_s4 + $0x18] sm:$0xff]  ;;  %v492_v4 = vld [vmem:[%s1133_s4 + $0x10] sm:$0xff]  ;;  %v366_v28 = vmax.f32 %v1029_v54, %v1031_v55 }
  0x21   : > { %432 = vmatpush.msra.mxu1 %v391_v29  ;;  %548 = vmatpush.msrb.mxu3 %v515_v51  ;;  %v509_v3 = vld [vmem:[%s1133_s4 + $0x98] sm:$0xff]  ;;  %v508_v5 = vld [vmem:[%s1133_s4 + $0x90] sm:$0xff]  ;;  %v491_v6 = vld [vmem:[%s1133_s4 + $0x8] sm:$0xff] }
  0x22   : > { %413 = vmatpush.msra.mxu0 %v374_v32  ;;  %529 = vmatpush.msrb.mxu2 %v498_v56  ;;  %v507_v7 = vld [vmem:[%s1133_s4 + $0x88] sm:$0xff]  ;;  %v490_v8 = vld [vmem:[%s1133_s4] sm:$0xff]  ;;  %v564_v13 = vld [vmem:[%s1134_s5 + $0x10] sm:$0xff] }
  0x23   : > { %433 = vmatpush.msra.mxu1 %v390_v33  ;;  %549 = vmatpush.msrb.mxu3 %v514_v57  ;;  %v506_v9 = vld [vmem:[%s1133_s4 + $0x80] sm:$0xff]  ;;  %v565_v14 = vld [vmem:[%s1134_s5 + $0x18] sm:$0xff]  ;;  %v563_v16 = vld [vmem:[%s1134_s5 + $0x8] sm:$0xff] }
  0x24   : > { %414 = vmatpush.msra.mxu0 %v373_v36  ;;  %530 = vmatpush.msrb.mxu2 %v497_v58  ;;  %v562_v15 = vld [vmem:[%s1134_s5] sm:$0xff] }
  0x25   : > { %434 = vmatpush.msra.mxu1 %v389_v37  ;;  %550 = vmatpush.msrb.mxu3 %v513_v59  ;;  %v808_v37 = vmov 256.0  }
  0x26   : > { %415 = vmatpush.msra.mxu0 %v372_v38  ;;  %531 = vmatpush.msrb.mxu2 %v496_v60 }
  0x27   : > { %435 = vmatpush.msra.mxu1 %v388_v39  ;;  %551 = vmatpush.msrb.mxu3 %v512_v61 }
  0x28   : > { %416 = vmatpush.msra.mxu0 %v371_v48  ;;  %532 = vmatpush.msrb.mxu2 %v495_v62 }
  0x29   : > { %436 = vmatpush.msra.mxu1 %v387_v49  ;;  %552 = vmatpush.msrb.mxu3 %v511_v63 }
  0x2a   : > { %417 = vmatpush.msra.mxu0 %v370_v52  ;;  %533 = vmatpush.msrb.mxu2 %v494_v0 }
  0x2b   : > { %437 = vmatpush.msra.mxu1 %v386_v53  ;;  %418 = vmatmul.f32.vlgmr.msra.gmra.mxu0 %v1029_v54 }
  0x2c   : > { %438 = vmatmul.f32.vlgmr.msra.gmra.mxu1 %v1031_v55  ;;  %553 = vmatpush.msrb.mxu3 %v510_v1 }
  0x2d   : > { %534 = vmatpush.msrb.mxu2 %v493_v2  ;;  %583 = vmatpush.msrb.mxu0 %v564_v13 }
  0x2e   : > { %554 = vmatpush.msrb.mxu3 %v509_v3  ;;  %603 = vmatpush.msrb.mxu1 %v565_v14 }
  0x2f   : > { %535 = vmatpush.msrb.mxu2 %v492_v4  ;;  %584 = vmatpush.msrb.mxu0 %v562_v15 }
  0x30   : > { %555 = vmatpush.msrb.mxu3 %v508_v5  ;;  %604 = vmatpush.msrb.mxu1 %v563_v16 }
  0x31   : > { %536 = vmatpush.msrb.mxu2 %v491_v6  ;;  %354 = vadd.xlane.f32.xlu1 %v353_v27 }
  0x32   : > { %556 = vmatpush.msrb.mxu3 %v507_v7 }
  0x33   : > { %537 = vmatpush.msrb.mxu2 %v490_v8 }
  0x34   : > { %557 = vmatpush.msrb.mxu3 %v506_v9 }
  0x39   : > { %367 = vmax.xlane.f32.xlu1 %v366_v28 }
  0xa4   : > { %v355_v44 = vpop.xlane.xlu1 %354 }
  0xa8   : > { %v419_v10 = vpop.f32.mrf.mxu0 }
  0xa9   : > { %v439_v11 = vpop.f32.mrf.mxu1 }
  0xaa   : > { %v440_v12 = vadd.f32 %v439_v11, %v419_v10 }
  0xac   : > { %774 = vmatmul.msk.f32.vlgmr.msra.gmra.mxu2 %vm446_vm0, %v440_v12  ;;  %775 = vmatmul.msk.f32.vlgmr.msra.gmra.mxu3 %vm446_vm0, %v440_v12  ;;  %v368_v46 = vpop.xlane.xlu1 %367 }
  0xad   : > { %369 = vst.msk [vmem:[%s341_s21] sm:$0xff] %vm364_vm2, %v368_v46 }
  0xb4   : > { %538 = vmatmul.f32.vlgmr.msrb.gmra.mxu2 %v1029_v54  ;;  %558 = vmatmul.f32.vlgmr.msrb.gmra.mxu3 %v1031_v55 }
 0x12f   : > { %v467_v17 = vpop.f32.mrf.mxu2  ;;  %v487_v18 = vpop.f32.mrf.mxu3 }
 0x137   : > { %v539_v19 = vpop.f32.mrf.mxu2  ;;  %v559_v20 = vpop.f32.mrf.mxu3 }
 0x138   : > { %v560_v21 = vadd.f32 %v559_v20, %v539_v19 }
 0x13a   : > { %776 = vmatmul.msk.f32.vlgmr.msrb.gmra.mxu0 %vm446_vm0, %v560_v21  ;;  %777 = vmatmul.msk.f32.vlgmr.msrb.gmra.mxu1 %vm446_vm0, %v560_v21 }
 0x1b7   : > { %v586_v22 = vpop.f32.mrf.mxu0  ;;  %v606_v23 = vpop.f32.mrf.mxu1 }
 0x1b8   : > { %v609_v24 = vmul.f32 %v586_v22, %v467_v17  ;;  %v610_v25 = vmul.f32 %v606_v23, %v487_v18 }
 0x1ba   : > { %v611_v26 = vmax.f32 %v609_v24, %v610_v25 }
 0x1bc   : > { %612 = vmax.xlane.f32.xlu0 %v611_v26 }
 0x22f   : > { %v613_v29 = vpop.xlane.xlu0 %612 }
 0x230   : > { %v614_v30 = vsub.f32 %v609_v24, %v613_v29  ;;  %v615_v31 = vsub.f32 %v610_v25, %v613_v29 }
 0x232   : > { %v616_v32 = vmul.f32 1.442695, %v614_v30  ;;  %v618_v33 = vmul.f32 1.442695, %v615_v31 }
 0x234   : > { %792 = vpow2.f32 %v616_v32 }
 0x235   : > { %794 = vpow2.f32 %v618_v33 }
 0x236   : > { %796 = vrcp.f32 %v808_v37 }
 0x23a   : > { %v793_v34 = vpop.eup %792 }
 0x23b   : > { %v795_v35 = vpop.eup %794 }
 0x23c   : > { %v620_v36 = vadd.f32 %v795_v35, %v793_v34  ;;  %v797_v38 = vpop.eup %796 }
 0x23d   : > { %v357_v39 = vmul.f32 256.0, %v797_v38  ;;  %vm361_vm1 = vweird.f32 %v797_v38 }
 0x23e   : > { %621 = vadd.xlane.f32.xlu0 %v620_v36 }
 0x23f   : > { %v358_v40 = vsub.f32 1.0, %v357_v39 }
 0x241   : > { %v359_v41 = vmul.f32 %v797_v38, %v358_v40 }
 0x243   : > { %v360_v42 = vadd.f32 %v797_v38, %v359_v41 }
 0x245   : > { %v362_v43 = vsel %vm361_vm1, %v797_v38, %v360_v42 }
 0x246   : > { %v363_v45 = vmul.f32 %v362_v43, %v355_v44 }
 0x248   : > { %365 = vst.msk [vmem:[%s337_s30] sm:$0xff] %vm364_vm2, %v363_v45 }
 0x2b1   : > { %v622_v47 = vpop.xlane.xlu0 %621 }
 0x2b2   : > { %798 = vrcp.f32 %v622_v47 }
 0x2b8   : > { %v799_v48 = vpop.eup %798 }
 0x2b9   : > { %v624_v49 = vmul.f32 %v799_v48, %v793_v34  ;;  %v625_v50 = vmul.f32 %v799_v48, %v795_v35 }
 0x2bb   : > { %v626_v51 = vmul.f32 %v624_v49, %v1029_v54  ;;  %v627_v52 = vmul.f32 %v625_v50, %v1031_v55 }
 0x2bd   : > { %v628_v53 = vadd.f32 %v626_v51, %v1029_v54  ;;  %v629_v56 = vadd.f32 %v627_v52, %v1031_v55 }
 0x2bf   : > { %630 = vst [vmem:[%s346_s11] sm:$0xff] %v628_v53 }
 0x2c0   : > { %631 = vst [vmem:[%s346_s11 + $0x8] sm:$0xff] %v629_v56 }
 0x2c1 PF: > { %s19_s27 = sadd.s32 1, %s806_s27  }
 0x2c2   : > { %p16_p4 = scmp.ge.s32.totalorder %s19_s27, 4  }
 0x2c4   :  { %18 = sbr.rel (!%p16_p4) target bundleno = 1 (0x1), region = 101 }

// kernel: attention_forward.3
= control target key start
LH: loop header
LB: loop body
LE: loop exit
PB: predicated region body
PF: predicated region fallthrough
CT: control target
= control target key end

     0   :  { %s2227_s0 = inlined_call_operand.vmem [shape: f32[2,8,256], index: 0, kind: input, shape index: {}]   ;;  %s2228_s1 = inlined_call_operand.vmem [shape: f32[2,8,4], index: 1, kind: input, shape index: {}]   ;;  %s2229_s2 = inlined_call_operand.vmem [shape: f32[2,4,8], index: 2, kind: input, shape index: {}]   ;;  %s2230_s3 = inlined_call_operand.vmem [shape: f32[9,256], index: 3, kind: input, shape index: {}]   ;;  %s2231_s4 = inlined_call_operand.vmem [shape: f32[8,72], index: 4, kind: input, shape index: {}]   ;;  %s2232_s5 = inlined_call_operand.vmem [shape: f32[8,1], index: 5, kind: input, shape index: {}]   ;;  %s2233_s6 = inlined_call_operand.vmem [shape: f32[20,72], index: 6, kind: input, shape index: {}]   ;;  %s2234_s7 = inlined_call_operand.vmem [shape: f32[8,1], index: 7, kind: input, shape index: {}]   ;;  %s2235_s8 = inlined_call_operand.vmem [shape: f32[4,1], index: 8, kind: input, shape index: {}]   ;;  %s2236_s9 = inlined_call_operand.vmem [shape: f32[8,4], index: 9, kind: input, shape index: {}]   ;;  %s2237_s10 = inlined_call_operand.vmem [shape: f32[1,4], index: 10, kind: input, shape index: {}]   ;;  %s2238_s11 = inlined_call_operand.vmem [shape: f32[4,8], index: 11, kind: input, shape index: {}]   ;;  %s2239_s12 = inlined_call_operand.vmem [shape: f32[4,1], index: 12, kind: input, shape index: {}]   ;;  %s2240_s13 = inlined_call_operand.vmem [shape: f32[8,4], index: 13, kind: input, shape index: {}]   ;;  %s2241_s14 = inlined_call_operand.vmem [shape: f32[8,1], index: 14, kind: input, shape index: {}]   ;;  %s2242_s15 = inlined_call_operand.vmem [shape: f32[8,72], index: 15, kind: input, shape index: {}]   ;;  %s2243_s16 = inlined_call_operand.vmem [shape: f32[8,1], index: 16, kind: input, shape index: {}]   ;;  %s2244_s17 = inlined_call_operand.vmem [shape: f32[8,8], index: 17, kind: input, shape index: {}]   ;;  %s2245_s18 = inlined_call_operand.vmem [shape: f32[8,8], index: 18, kind: input, shape index: {}]   ;;  %s2246_s19 = inlined_call_operand.vmem [shape: f32[8,1], index: 19, kind: input, shape index: {}]   ;;  %s2247_s20 = inlined_call_operand.vmem [shape: f32[2,8,256], index: 20, kind: output, shape index: {}]  }
   0x1   :  { %2268 = sst [smem:[#allocation3_spill]] %s2227_s0 }
   0x2   :  { %2269 = sst [smem:[#allocation4_spill]] %s2228_s1  ;;  %s1745_s1 = smov 0  }
   0x3   :  { %2270 = sst [smem:[#allocation5_spill]] %s2229_s2 }
   0x4   :  { %2271 = sst [smem:[#allocation6_spill]] %s2230_s3 }
   0x5   :  { %2272 = sst [smem:[#allocation7_spill]] %s2231_s4 }
   0x6   :  { %2273 = sst [smem:[#allocation8_spill]] %s2232_s5 }
   0x7   :  { %2274 = sst [smem:[#allocation9_spill]] %s2244_s17 }
   0x8   :  { %2275 = sst [smem:[#allocation10_spill]] %s2245_s18 }
   0x9   :  { %2276 = sst [smem:[#allocation11_spill]] %s2247_s20 }
   0xa LB: > { %2277 = sst [smem:[#allocation2_spill]] %s1629_s1  ;;  %s1551_s22 = sadd.s32 4294967295, %s1629_s1   ;;  %s1629_s1 = sphi %s1745_s1, %s30_s1  }
   0xb   : > { %p1555_p0 = scmp.ge.s32.totalorder %s1629_s1, 1  ;;  %p580_p1 = scmp.lt.s32.totalorder %s1629_s1, 3 }
   0xd   : > { %p581_p2 = pnand %p1555_p0, %p580_p1 }
   0xe   : > { %p646_p3 = scmp.lt.s32.totalorder (!%p581_p2), %s1551_s22, 1  ;;  %s2278_s25 = sld [smem:[#allocation3_spill]] (!%p581_p2) }
   0xf   : > { %584 = sbr.rel (%p581_p2) target bundleno = 1726 (0x6be), region = 100  ;;  %s2264_s26 = smov (!%p581_p2), 112  }
  0x10   : > { %s2262_s27 = smov (!%p581_p2), 111   ;;  %s2258_s28 = smov (!%p581_p2), 113  }
  0x11   : > { %s2260_s4 = smov (!%p581_p2), 127   ;;  %s2256_s29 = smov (!%p581_p2), 1  }
  0x12   : > { %s2254_s30 = smov (!%p581_p2), 15   ;;  %s2252_s0 = smov (!%p581_p2), 16  }
  0x13   : > { %s2250_s21 = smov (!%p581_p2), 17   ;;  %s2280_s5 = sld [smem:[#allocation8_spill]] (!%p581_p2) }
  0x14   : > { %s2298_s22 = smov (!%p646_p3, %s1551_s22), 1  ;;  %v675_v3 = vlaneseq  ;;  %v1639_v36 = vmov 0   ;;  %vm771_vm8 = vcmask 588800   ;;  %s2282_s24 = smov 1   ;;  %vm979_vm9 = vcmask 64512  }
  0x15   : > { %s2249_s23 = sshll.u32 %s2298_s22, 4  ;;  %1611 = vset.pattern.permute.xlu1 %v1639_v36  ;;  %1612 = vset.pattern.permute.xlu0 %v1639_v36  ;;  %s2283_s2 = smov 15   ;;  %vm1042_vm10 = vcmask 1043456   ;;  %vm1038_vm11 = vcmask 31744  }
  0x16   : > { %s650_s3 = scalar_lea.vmem %s2278_s25, %s2249_s23  ;;  %v1797_v6 = vand.u32 127, %v675_v3  ;;  %s2279_s25 = sld [smem:[#allocation6_spill]]  ;;  %1613 = vset.pattern.permute.xlu2 %v1639_v36 }
  0x17   : > { %v1761_v0 = vld [vmem:[%s650_s3] sm:$0xff]  ;;  %v1769_v1 = vld [vmem:[%s650_s3 + $0x8] sm:$0xff]  ;;  %s2284_s3 = smov 16   ;;  %s2285_s23 = smov 17  }
  0x18   : > { %743 = vrot.lane.b32.xlu1 %v1761_v0, %s2264_s26  ;;  %754 = vrot.lane.b32.xlu0 %v1761_v0, %s2262_s27  ;;  %vm747_vm0 = vcmp.lt.s32.totalorder %v1797_v6, 112  ;;  %vm758_vm1 = vcmp.lt.s32.totalorder %v1797_v6, 111  ;;  %vm736_vm2 = vcmp.lt.s32.totalorder %v1797_v6, 113  ;;  %vm725_vm3 = vcmp.lt.s32.totalorder %v1797_v6, 127  ;;  %s2289_s17 = smov 111   ;;  %s2290_s18 = smov 127  }
  0x19   : > { %732 = vrot.lane.b32.xlu2 %v1761_v0, %s2258_s28  ;;  %v765_v35 = vld [vmem:[%s2280_s5] sm:$0xff]  ;;  %vm710_vm4 = vcmp.lt.s32.totalorder %v1797_v6, 1  ;;  %vm699_vm5 = vcmp.lt.s32.totalorder %v1797_v6, 15  ;;  %vm688_vm6 = vcmp.lt.s32.totalorder %v1797_v6, 16  ;;  %vm677_vm7 = vcmp.lt.s32.totalorder %v1797_v6, 17  ;;  %s2287_s5 = sld [smem:[#allocation5_spill]] }
  0x1a   : > { %s2291_s20 = smov 113  }
  0x1c   : > { %v1802_v8 = vld [vmem:[%s2279_s25] sm:$0xff]  ;;  %v1807_v9 = vld [vmem:[%s2279_s25 + $0x8] sm:$0xff]  ;;  %v1814_v10 = vld [vmem:[%s2279_s25 + $0x10] ss:$0 sm:$0xff] }
  0x1d   : > { %v1819_v11 = vld [vmem:[%s2279_s25 + $0x18] ss:$0 sm:$0xff]  ;;  %v1823_v14 = vperm.slane %v1802_v8, 7  ;;  %v1826_v15 = vperm.slane %v1807_v9, 7  ;;  %v1839_v22 = vperm.slane %v1802_v8, 6  ;;  %v1842_v23 = vperm.slane %v1807_v9, 6 }
  0x1e   : > { %v1852_v29 = vperm.slane %v1802_v8, 5  ;;  %v1855_v30 = vperm.slane %v1807_v9, 5  ;;  %v1860_v33 = vperm.slane %v1802_v8, 4  ;;  %v1863_v34 = vperm.slane %v1807_v9, 4 }
  0x1f   : > { %v1880_v45 = vperm.slane %v1802_v8, 3  ;;  %v1883_v46 = vperm.slane %v1807_v9, 3  ;;  %v1887_v48 = vperm.slane %v1802_v8, 2  ;;  %v1890_v49 = vperm.slane %v1807_v9, 2 }
  0x20   : > { %745 = vrot.lane.b32.xlu1 %v1769_v1, %s2264_s26  ;;  %756 = vrot.lane.b32.xlu0 %v1769_v1, %s2262_s27  ;;  %v719_v43 = vmul.f32 %v1860_v33, %v1761_v0  ;;  %v720_v44 = vmul.f32 %v1863_v34, %v1769_v1  ;;  %v1906_v60 = vperm.slane %v1802_v8, 1  ;;  %v1909_v61 = vperm.slane %v1807_v9, 1 }
  0x21   : > { %734 = vrot.lane.b32.xlu2 %v1769_v1, %s2258_s28 }
  0x28   : > { %723 = vrot.lane.b32.xlu1 %v1769_v1, %s2260_s4  ;;  %721 = vrot.lane.b32.xlu0 %v1761_v0, %s2260_s4 }
  0x29   : > { %706 = vrot.lane.b32.xlu2 %v1761_v0, %s2256_s29 }
  0x30   : > { %695 = vrot.lane.b32.xlu1 %v1761_v0, %s2254_s30  ;;  %708 = vrot.lane.b32.xlu0 %v1769_v1, %s2256_s29  ;;  %s1558_s29 = sshll.u32 %s2298_s22, 3 }
  0x31   : > { %697 = vrot.lane.b32.xlu2 %v1769_v1, %s2254_s30  ;;  %s1559_s30 = sshll.u32 %s2298_s22, 2 }
  0x32   : > { %s658_s25 = scalar_lea.vmem %s2287_s5, %s1559_s30  ;;  %s2288_s5 = smov 112  }
  0x33   : > { %s2292_s30 = sld [smem:[#allocation10_spill]] }
  0x38   : > { %686 = vrot.lane.b32.xlu1 %v1769_v1, %s2252_s0  ;;  %684 = vrot.lane.b32.xlu0 %v1761_v0, %s2252_s0 }
  0x39   : > { %671 = vrot.lane.b32.xlu2 %v1761_v0, %s2250_s21 }
  0x40   : > { %673 = vrot.lane.b32.xlu0 %v1769_v1, %s2250_s21  ;;  %768 = vperm.xlu1 %1611, %v765_v35   ;;  %s2281_s21 = sld [smem:[#allocation7_spill]] }
  0x73   : > { %v733_v2 = vpop.permute.xlu2 %732 }
  0x7b   : > { %v735_v7 = vpop.permute.xlu2 %734 }
  0x7c   : > { %v737_v24 = vsel %vm736_vm2, %v733_v2, %v735_v7  ;;  %v738_v25 = vsel %vm736_vm2, %v735_v7, %v733_v2  ;;  %v1922_v7 = vperm.slane %v1807_v9, 0 }
  0x7d   : > { %v741_v31 = vmul.f32 %v1839_v22, %v737_v24  ;;  %v742_v32 = vmul.f32 %v1842_v23, %v738_v25 }
  0x83   : > { %v707_v28 = vpop.permute.xlu2 %706 }
  0x8a   : > { %v744_v4 = vpop.permute.xlu1 %743  ;;  %v755_v5 = vpop.permute.xlu0 %754 }
  0x8b   : > { %v698_v47 = vpop.permute.xlu2 %697 }
  0x92   : > { %v746_v12 = vpop.permute.xlu1 %745  ;;  %v757_v13 = vpop.permute.xlu0 %756 }
  0x93   : > { %v748_v16 = vsel %vm747_vm0, %v744_v4, %v746_v12  ;;  %v749_v17 = vsel %vm747_vm0, %v746_v12, %v744_v4  ;;  %v759_v18 = vsel %vm758_vm1, %v755_v5, %v757_v13  ;;  %v760_v19 = vsel %vm758_vm1, %v757_v13, %v755_v5  ;;  %v672_v4 = vpop.permute.xlu2 %671 }
  0x94   : > { %v763_v20 = vmul.f32 %v1814_v10, %v759_v18  ;;  %v764_v21 = vmul.f32 %v1819_v11, %v760_v19  ;;  %v752_v26 = vmul.f32 %v1823_v14, %v748_v16  ;;  %v753_v27 = vmul.f32 %v1826_v15, %v749_v17  ;;  %v668_v19 = vld [vmem:[%s2281_s21] sm:$0xff] }
  0x95   : > { %v1919_v5 = vperm.slane %v1802_v8, 0 }
  0x96   : > { %782 = vmatpush.msra.mxu0 %v763_v20  ;;  %802 = vmatpush.msra.mxu1 %v764_v21 }
  0x98   : > { %783 = vmatpush.msra.mxu0 %v752_v26  ;;  %803 = vmatpush.msra.mxu1 %v753_v27 }
  0x9a   : > { %v724_v37 = vpop.permute.xlu1 %723  ;;  %784 = vmatpush.msra.mxu0 %v741_v31  ;;  %804 = vmatpush.msra.mxu1 %v742_v32  ;;  %v722_v38 = vpop.permute.xlu0 %721 }
  0x9b   : > { %v726_v39 = vsel %vm725_vm3, %v722_v38, %v724_v37  ;;  %v727_v40 = vsel %vm725_vm3, %v724_v37, %v722_v38 }
  0x9c   : > { %v730_v41 = vmul.f32 %v1852_v29, %v726_v39  ;;  %v731_v42 = vmul.f32 %v1855_v30, %v727_v40 }
  0x9e   : > { %785 = vmatpush.msra.mxu0 %v730_v41  ;;  %805 = vmatpush.msra.mxu1 %v731_v42 }
  0xa0   : > { %786 = vmatpush.msra.mxu0 %v719_v43  ;;  %806 = vmatpush.msra.mxu1 %v720_v44 }
  0xa2   : > { %v696_v50 = vpop.permute.xlu1 %695  ;;  %v709_v51 = vpop.permute.xlu0 %708 }
  0xa3   : > { %v711_v52 = vsel %vm710_vm4, %v707_v28, %v709_v51  ;;  %v712_v53 = vsel %vm710_vm4, %v709_v51, %v707_v28  ;;  %v700_v54 = vsel %vm699_vm5, %v696_v50, %v698_v47  ;;  %v701_v55 = vsel %vm699_vm5, %v698_v47, %v696_v50 }
  0xa4   : > { %v715_v56 = vmul.f32 %v1880_v45, %v712_v53  ;;  %v716_v57 = vmul.f32 %v1883_v46, %v711_v52  ;;  %v704_v58 = vmul.f32 %v1887_v48, %v701_v55  ;;  %v705_v59 = vmul.f32 %v1890_v49, %v700_v54 }
  0xa6   : > { %787 = vmatpush.msra.mxu0 %v715_v56  ;;  %807 = vmatpush.msra.mxu1 %v716_v57  ;;  %v961_v57 = vld [vmem:[%s2235_s8] sm:$0xf] }
  0xa8   : > { %788 = vmatpush.msra.mxu0 %v704_v58  ;;  %808 = vmatpush.msra.mxu1 %v705_v59  ;;  %v974_v59 = vld [vmem:[%s2236_s9] sm:$0xff] }
  0xaa   : > { %v687_v62 = vpop.permute.xlu1 %686  ;;  %v685_v63 = vpop.permute.xlu0 %684 }
  0xab   : > { %v689_v0 = vsel %vm688_vm6, %v685_v63, %v687_v62  ;;  %v690_v1 = vsel %vm688_vm6, %v687_v62, %v685_v63 }
  0xac   : > { %v693_v2 = vmul.f32 %v1906_v60, %v690_v1  ;;  %v694_v3 = vmul.f32 %v1909_v61, %v689_v0  ;;  %v1005_v0 = vld [vmem:[%s2238_s11] sm:$0xf] }
  0xad   : > { %v973_v1 = vld [vmem:[%s658_s25] sm:$0xf] }
  0xae   : > { %789 = vmatpush.msra.mxu0 %v693_v2  ;;  %809 = vmatpush.msra.mxu1 %v694_v3 }
  0xb2   : > { %v674_v12 = vpop.permute.xlu0 %673  ;;  %v769_v8 = vpop.permute.xlu1 %768 }
  0xb3   : > { %v678_v13 = vsel %vm677_vm7, %v672_v4, %v674_v12  ;;  %v679_v16 = vsel %vm677_vm7, %v674_v12, %v672_v4 }
  0xb4   : > { %v682_v17 = vmul.f32 %v1919_v5, %v679_v16  ;;  %v683_v18 = vmul.f32 %v1922_v7, %v678_v13 }
  0xb6   : > { %790 = vmatpush.msra.mxu0 %v682_v17  ;;  %810 = vmatpush.msra.mxu1 %v683_v18 }
  0xb7   : > { %1562 = vmatmul.msk.f32.vlgmr.msra.gmra.mxu0 %vm771_vm8, %v668_v19  ;;  %1563 = vmatmul.msk.f32.vlgmr.msra.gmra.mxu1 %vm771_vm8, %v668_v19 }
  0xb8   : > { %998 = vmatpush.msrb.mxu0 %v974_v59 }
  0xbf   : > { %1570 = vmatmul.msk.f32.vlgmr.msrb.gmra.mxu0 %vm979_vm9, %v973_v1 }
 0x134   : > { %v792_v9 = vpop.f32.mrf.mxu0  ;;  %v812_v20 = vpop.f32.mrf.mxu1 }
 0x135   : > { %v793_v21 = vadd.f32 %v792_v9, %v769_v8  ;;  %v813_v24 = vadd.f32 %v812_v20, %v769_v8  ;;  %v1007_v20 = vld [vmem:[%s2239_s12] sm:$0xf] }
 0x137   : > { %v815_v25 = vmax.f32 %v793_v21, 0.0  ;;  %v816_v26 = vmax.f32 %v813_v24, 0.0 }
 0x139   : > { %v1935_v27 = vmin.f32 %v815_v25, 6.0  ;;  %v1937_v28 = vmin.f32 %v816_v26, 6.0 }
 0x13b   : > { %879 = vrot.lane.b32.xlu0 %v1937_v28, %s2262_s27  ;;  %869 = vrot.lane.b32.xlu1 %v1935_v27, %s2264_s26  ;;  %v851_v17 = vmul.f32 %v1935_v27, %v1860_v33  ;;  %v852_v18 = vmul.f32 %v1937_v28, %v1863_v34 }
 0x13c   : > { %877 = vrot.lane.b32.xlu2 %v1935_v27, %s2262_s27 }
 0x143   : > { %861 = vrot.lane.b32.xlu0 %v1935_v27, %s2258_s28  ;;  %863 = vrot.lane.b32.xlu1 %v1937_v28, %s2258_s28  ;;  %s2286_s28 = sld [smem:[#allocation4_spill]] }
 0x144   : > { %871 = vrot.lane.b32.xlu2 %v1937_v28, %s2264_s26 }
 0x14b   : > { %855 = vrot.lane.b32.xlu0 %v1937_v28, %s2260_s4  ;;  %843 = vrot.lane.b32.xlu1 %v1935_v27, %s2282_s24 }
 0x14c   : > { %853 = vrot.lane.b32.xlu2 %v1935_v27, %s2260_s4  ;;  %s654_s4 = scalar_lea.vmem %s2286_s28, %s1558_s29  ;;  %s2293_s28 = sld [smem:[#allocation9_spill]] }
 0x14d   : > { %v1006_v58 = vld [vmem:[%s654_s4] sm:$0xff] }
 0x14e   : > { %1031 = vmatpush.msrb.mxu1 %v1006_v58 }
 0x14f   : > { %1571 = vmatmul.msk.f32.vlgmr.msrb.gmra.mxu1 %vm979_vm9, %v1005_v0 }
 0x153   : > { %835 = vrot.lane.b32.xlu0 %v1935_v27, %s2283_s2  ;;  %837 = vrot.lane.b32.xlu1 %v1937_v28, %s2283_s2 }
 0x154   : > { %845 = vrot.lane.b32.xlu2 %v1937_v28, %s2282_s24 }
 0x15b   : > { %829 = vrot.lane.b32.xlu0 %v1937_v28, %s2284_s3  ;;  %819 = vrot.lane.b32.xlu1 %v1935_v27, %s2285_s23 }
 0x15c   : > { %827 = vrot.lane.b32.xlu2 %v1935_v27, %s2284_s3 }
 0x163   : > { %964 = vperm.xlu0 %1612, %v961_v57  }
 0x164   : > { %821 = vrot.lane.b32.xlu2 %v1937_v28, %s2285_s23 }
 0x16b   : > { %1010 = vperm.xlu0 %1612, %v1007_v20  }
 0x196   : > { %v878_v31 = vpop.permute.xlu2 %877 }
 0x19e   : > { %v872_v32 = vpop.permute.xlu2 %871 }
 0x1a6   : > { %v854_v37 = vpop.permute.xlu2 %853 }
 0x1ad   : > { %v880_v35 = vpop.permute.xlu0 %879  ;;  %v870_v36 = vpop.permute.xlu1 %869 }
 0x1ae   : > { %v873_v38 = vsel %vm747_vm0, %v870_v36, %v872_v32  ;;  %v874_v39 = vsel %vm747_vm0, %v872_v32, %v870_v36  ;;  %v881_v40 = vsel %vm758_vm1, %v878_v31, %v880_v35  ;;  %v882_v41 = vsel %vm758_vm1, %v880_v35, %v878_v31  ;;  %v846_v56 = vpop.permute.xlu2 %845  ;;  %v1160_v31 = vld [vmem:[%s2241_s14] sm:$0xff] }
 0x1af   : > { %v883_v42 = vmul.f32 %v1814_v10, %v881_v40  ;;  %v884_v43 = vmul.f32 %v1819_v11, %v882_v41  ;;  %v875_v44 = vmul.f32 %v873_v38, %v1823_v14  ;;  %v876_v47 = vmul.f32 %v874_v39, %v1826_v15  ;;  %1163 = vperm.xlu0 %1612, %v1160_v31  }
 0x1b1   : > { %904 = vmatpush.msra.mxu2 %v883_v42  ;;  %930 = vmatpush.msra.mxu3 %v884_v43 }
 0x1b3   : > { %905 = vmatpush.msra.mxu2 %v875_v44  ;;  %931 = vmatpush.msra.mxu3 %v876_v47  ;;  %v885_v47 = vld [vmem:[%s2233_s6] sm:$0xff] }
 0x1b5   : > { %v862_v50 = vpop.permute.xlu0 %861  ;;  %v864_v51 = vpop.permute.xlu1 %863 }
 0x1b6   : > { %v865_v52 = vsel %vm736_vm2, %v862_v50, %v864_v51  ;;  %v866_v53 = vsel %vm736_vm2, %v864_v51, %v862_v50  ;;  %v828_v19 = vpop.permute.xlu2 %827  ;;  %v886_v50 = vld [vmem:[%s2233_s6 + $0x8] sm:$0xff] }
 0x1b7   : > { %v867_v54 = vmul.f32 %v865_v52, %v1839_v22  ;;  %v868_v55 = vmul.f32 %v866_v53, %v1842_v23  ;;  %v1616_v53 = vld [vmem:[%s2237_s10] ss:$0 sm:$0xff] }
 0x1b9   : > { %906 = vmatpush.msra.mxu2 %v867_v54  ;;  %932 = vmatpush.msra.mxu3 %v868_v55  ;;  %v1000_v54 = vpop.f32.mrf.mxu0 }
 0x1ba   : > { %v1001_v55 = vadd.f32 %v1616_v53, %v1000_v54 }
 0x1bc   : > { %v1003_v59 = vmax.f32 %v1001_v55, 0.0 }
 0x1bd   : > { %v856_v62 = vpop.permute.xlu0 %855  ;;  %v844_v63 = vpop.permute.xlu1 %843 }
 0x1be   : > { %v857_v2 = vsel %vm725_vm3, %v854_v37, %v856_v62  ;;  %v858_v3 = vsel %vm725_vm3, %v856_v62, %v854_v37  ;;  %v847_v13 = vsel %vm710_vm4, %v844_v63, %v846_v56  ;;  %v848_v16 = vsel %vm710_vm4, %v846_v56, %v844_v63  ;;  %v822_v32 = vpop.permute.xlu2 %821 }
 0x1bf   : > { %v859_v4 = vmul.f32 %v857_v2, %v1852_v29  ;;  %v860_v12 = vmul.f32 %v858_v3, %v1855_v30  ;;  %v849_v8 = vmul.f32 %v848_v16, %v1880_v45  ;;  %v850_v9 = vmul.f32 %v847_v13, %v1883_v46 }
 0x1c0   : > { %v1004_v2 = vmin.f32 %v1003_v59, 6.0 }
 0x1c1   : > { %907 = vmatpush.msra.mxu2 %v859_v4  ;;  %933 = vmatpush.msra.mxu3 %v860_v12 }
 0x1c3   : > { %908 = vmatpush.msra.mxu2 %v851_v17  ;;  %934 = vmatpush.msra.mxu3 %v852_v18 }
 0x1c5   : > { %v836_v21 = vpop.permute.xlu0 %835  ;;  %v838_v24 = vpop.permute.xlu1 %837  ;;  %909 = vmatpush.msra.mxu2 %v849_v8  ;;  %935 = vmatpush.msra.mxu3 %v850_v9 }
 0x1c6   : > { %v839_v25 = vsel %vm699_vm5, %v836_v21, %v838_v24  ;;  %v840_v26 = vsel %vm699_vm5, %v838_v24, %v836_v21 }
 0x1c7   : > { %v841_v27 = vmul.f32 %v840_v26, %v1887_v48  ;;  %v842_v28 = vmul.f32 %v839_v25, %v1890_v49 }
 0x1c9   : > { %910 = vmatpush.msra.mxu2 %v841_v27  ;;  %936 = vmatpush.msra.mxu3 %v842_v28 }
 0x1cc   : > { %v1033_v12 = vpop.f32.mrf.mxu1 }
 0x1cd   : > { %v830_v35 = vpop.permute.xlu0 %829  ;;  %v820_v36 = vpop.permute.xlu1 %819 }
 0x1ce   : > { %v831_v37 = vsel %vm688_vm6, %v828_v19, %v830_v35  ;;  %v832_v38 = vsel %vm688_vm6, %v830_v35, %v828_v19  ;;  %v823_v39 = vsel %vm677_vm7, %v820_v36, %v822_v32  ;;  %v824_v40 = vsel %vm677_vm7, %v822_v32, %v820_v36  ;;  %v887_v36 = vld [vmem:[%s2233_s6 + $0x10] sm:$0xf] }
 0x1cf   : > { %v833_v41 = vmul.f32 %v832_v38, %v1906_v60  ;;  %v834_v42 = vmul.f32 %v831_v37, %v1909_v61  ;;  %v825_v43 = vmul.f32 %v824_v40, %v1919_v5  ;;  %v826_v44 = vmul.f32 %v823_v39, %v1922_v7 }
 0x1d1   : > { %911 = vmatpush.msra.mxu2 %v833_v41  ;;  %937 = vmatpush.msra.mxu3 %v834_v42 }
 0x1d3   : > { %912 = vmatpush.msra.mxu2 %v825_v43  ;;  %938 = vmatpush.msra.mxu3 %v826_v44 }
 0x1d4   : > { %1564 = vmatmul.msk.f32.vlgmr.msra.gmra.mxu2 %vm771_vm8, %v885_v47  ;;  %1567 = vmatmul.msk.f32.vlgmr.msra.gmra.mxu3 %vm771_vm8, %v885_v47  ;;  %v1159_v47 = vld [vmem:[%s2240_s13] sm:$0xff] }
 0x1d5   : > { %v965_v56 = vpop.permute.xlu0 %964 }
 0x1dc   : > { %1565 = vmatmul.msk.f32.gmra.mxu2 %vm771_vm8, %v886_v50  ;;  %1568 = vmatmul.msk.f32.gmra.mxu3 %vm771_vm8, %v886_v50 }
 0x1dd   : > { %v1011_v37 = vpop.permute.xlu0 %1010 }
 0x1de   : > { %v1034_v39 = vadd.f32 %v1033_v12, %v1011_v37  ;;  %v1339_v12 = vld [vmem:[%s2243_s16] sm:$0xff] }
 0x1e0   : > { %v1036_v40 = vmax.f32 %v1034_v39, 0.0 }
 0x1e2   : > { %v1037_v44 = vmin.f32 %v1036_v40, 6.0 }
 0x1e4   : > { %1566 = vmatmul.msk.f32.gmra.mxu2 %vm771_vm8, %v887_v36  ;;  %1569 = vmatmul.msk.f32.gmra.mxu3 %vm771_vm8, %v887_v36 }
 0x257   : > { %v2058_v51 = vpop.f32.mrf.mxu2  ;;  %v2060_v52 = vpop.f32.mrf.mxu3 }
 0x25f   : > { %v2065_v57 = vpop.f32.mrf.mxu2  ;;  %v2067_v58 = vpop.f32.mrf.mxu3 }
 0x260   : > { %v967_v62 = vadd.f32 %v965_v56, %v2065_v57  ;;  %v968_v63 = vadd.f32 %v965_v56, %v2067_v58  ;;  %v1164_v56 = vpop.permute.xlu0 %1163 }
 0x262   : > { %v969_v0 = vmax.f32 %v967_v62, 0.0  ;;  %v970_v1 = vmax.f32 %v968_v63, 0.0 }
 0x264   : > { %v971_v3 = vmin.f32 %v969_v0, 6.0  ;;  %v972_v4 = vmin.f32 %v970_v1, 6.0 }
 0x266   : > { %1572 = vmatpush.msk.msra.mxu0 %vm1042_vm10, %v971_v3  ;;  %1574 = vmatpush.msk.msra.mxu1 %vm1042_vm10, %v972_v4 }
 0x267   : > { %1573 = vmatmul.msk.f32.vlgmr.msra.gmra.mxu0 %vm1038_vm11, %v1004_v2  ;;  %1575 = vmatmul.msk.f32.vlgmr.msra.gmra.mxu1 %vm1038_vm11, %v1004_v2  ;;  %v2095_v54 = vpop.f32.mrf.mxu2  ;;  %v2097_v55 = vpop.f32.mrf.mxu3 }
 0x2e4   : > { %v1066_v13 = vpop.f32.mrf.mxu0  ;;  %v1086_v16 = vpop.f32.mrf.mxu1 }
 0x2e5   : > { %v1089_v17 = vmul.f32 0.5, %v1066_v13  ;;  %v1090_v18 = vmul.f32 0.5, %v1086_v16  ;;  %v949_v13 = vld [vmem:[%s2234_s7] sm:$0xff] }
 0x2e6   : > { %v1458_v16 = vld [vmem:[%s2246_s19] sm:$0xff] }
 0x2e7   : > { %v1091_v19 = vsel %vm1042_vm10, %v1089_v17, -inf  ;;  %v1092_v8 = vsel %vm1042_vm10, %v1090_v18, -inf }
 0x2e8   : > { %v1093_v9 = vmax.f32 %v1091_v19, %v1092_v8 }
 0x2ea   : > { %1094 = vmax.xlane.f32.xlu1 %v1093_v9 }
 0x35d   : > { %v1095_v20 = vpop.xlane.xlu1 %1094 }
 0x35e   : > { %v1096_v21 = vsub.f32 %v1089_v17, %v1095_v20  ;;  %v1097_v24 = vsub.f32 %v1090_v18, %v1095_v20 }
 0x360   : > { %v1098_v25 = vmul.f32 1.442695, %v1096_v21  ;;  %v1100_v26 = vmul.f32 1.442695, %v1097_v24 }
 0x362   : > { %1617 = vpow2.f32 %v1098_v25 }
 0x363   : > { %1619 = vpow2.f32 %v1100_v26 }
 0x368   : > { %v1618_v27 = vpop.eup %1617 }
 0x369   : > { %v1620_v28 = vpop.eup %1619  ;;  %v1102_v31 = vsel %vm1042_vm10, %v1618_v27, 0.0 }
 0x36a   : > { %v1103_v32 = vsel %vm1042_vm10, %v1620_v28, 0.0 }
 0x36b   : > { %v1104_v35 = vadd.f32 %v1103_v32, %v1102_v31 }
 0x36d   : > { %1105 = vadd.xlane.f32.xlu2 %v1104_v35 }
 0x3e0   : > { %v1106_v38 = vpop.xlane.xlu2 %1105 }
 0x3e1   : > { %1621 = vrcp.f32 %v1106_v38 }
 0x3e7   : > { %v1622_v41 = vpop.eup %1621 }
 0x3e8   : > { %v1108_v42 = vmul.f32 %v1622_v41, %v1618_v27  ;;  %v1109_v43 = vmul.f32 %v1622_v41, %v1620_v28 }
 0x3ea   : > { %1576 = vmatpush.msk.msrb.mxu0 %vm1042_vm10, %v1108_v42  ;;  %1578 = vmatpush.msk.msrb.mxu1 %vm1042_vm10, %v1109_v43 }
 0x3eb   : > { %1577 = vmatmul.msk.f32.vlgmr.msrb.gmra.mxu0 %vm1038_vm11, %v1037_v44  ;;  %1579 = vmatmul.msk.f32.vlgmr.msrb.gmra.mxu1 %vm1038_vm11, %v1037_v44 }
 0x468   : > { %v1136_v50 = vpop.f32.mrf.mxu0  ;;  %v1156_v53 = vpop.f32.mrf.mxu1 }
 0x469   : > { %1580 = vmatpush.msk.msrb.mxu2 %vm1042_vm10, %v1136_v50  ;;  %1582 = vmatpush.msk.msrb.mxu3 %vm1042_vm10, %v1156_v53 }
 0x46a   : > { %1581 = vmatmul.msk.f32.vlgmr.msrb.gmra.mxu2 %vm1038_vm11, %v1159_v47  ;;  %1583 = vmatmul.msk.f32.vlgmr.msrb.gmra.mxu3 %vm1038_vm11, %v1159_v47 }
 0x4ed   : > { %v1192_v59 = vpop.f32.mrf.mxu2  ;;  %v1212_v62 = vpop.f32.mrf.mxu3 }
 0x4ee   : > { %v1193_v63 = vadd.f32 %v1192_v59, %v1164_v56  ;;  %v1213_v0 = vadd.f32 %v1212_v62, %v1164_v56 }
 0x4f0   : > { %v1215_v1 = vmax.f32 %v1193_v63, 0.0  ;;  %v1216_v2 = vmax.f32 %v1213_v0, 0.0 }
 0x4f2   : > { %v2099_v3 = vmin.f32 %v1215_v1, 6.0  ;;  %v2101_v4 = vmin.f32 %v1216_v2, 6.0 }
 0x4f4   : > { %1272 = vrot.lane.b32.xlu1 %v2101_v4, %s2288_s5  ;;  %1270 = vrot.lane.b32.xlu2 %v2099_v3, %s2288_s5  ;;  %s2294_s5 = sshll.u32 %s2298_s22, 4 }
 0x4f5   : > { %1278 = vrot.lane.b32.xlu0 %v2099_v3, %s2289_s17 }
 0x4fc   : > { %1244 = vrot.lane.b32.xlu1 %v2099_v3, %s2282_s24  ;;  %1256 = vrot.lane.b32.xlu2 %v2101_v4, %s2290_s18 }
 0x4fd   : > { %1280 = vrot.lane.b32.xlu0 %v2101_v4, %s2289_s17 }
 0x504   : > { %1238 = vrot.lane.b32.xlu1 %v2101_v4, %s2283_s2  ;;  %1236 = vrot.lane.b32.xlu2 %v2099_v3, %s2283_s2 }
 0x505   : > { %1262 = vrot.lane.b32.xlu0 %v2099_v3, %s2291_s20 }
 0x50c   : > { %1220 = vrot.lane.b32.xlu1 %v2099_v3, %s2285_s23  ;;  %1230 = vrot.lane.b32.xlu2 %v2101_v4, %s2284_s3 }
 0x50d   : > { %1264 = vrot.lane.b32.xlu0 %v2101_v4, %s2291_s20  ;;  %s2295_s20 = sld [smem:[#allocation11_spill]] }
 0x513   : > { %s663_s1 = scalar_lea.vmem %s2295_s20, %s2294_s5 }
 0x514   : > { %1342 = vperm.xlu1 %1611, %v1339_v12   ;;  %952 = vperm.xlu2 %1613, %v949_v13  }
 0x515   : > { %1254 = vrot.lane.b32.xlu0 %v2099_v3, %s2290_s18 }
 0x51d   : > { %1246 = vrot.lane.b32.xlu0 %v2101_v4, %s2282_s24 }
 0x525   : > { %1228 = vrot.lane.b32.xlu0 %v2099_v3, %s2284_s3 }
 0x52d   : > { %1222 = vrot.lane.b32.xlu0 %v2101_v4, %s2285_s23 }
 0x535   : > { %1461 = vperm.xlu0 %1612, %v1458_v16  }
 0x54e   : > { %v1271_v17 = vpop.permute.xlu2 %1270 }
 0x556   : > { %v1257_v18 = vpop.permute.xlu2 %1256 }
 0x55e   : > { %v1237_v19 = vpop.permute.xlu2 %1236 }
 0x566   : > { %v1231_v8 = vpop.permute.xlu2 %1230  ;;  %v1273_v20 = vpop.permute.xlu1 %1272 }
 0x567   : > { %v1279_v9 = vpop.permute.xlu0 %1278  ;;  %v1274_v27 = vsel %vm747_vm0, %v1271_v17, %v1273_v20  ;;  %v1275_v28 = vsel %vm747_vm0, %v1273_v20, %v1271_v17 }
 0x568   : > { %v1277_v38 = vmul.f32 %v1275_v28, %v1826_v15 }
 0x56e   : > { %v953_v21 = vpop.permute.xlu2 %952  ;;  %v1245_v15 = vpop.permute.xlu1 %1244 }
 0x56f   : > { %v955_v24 = vadd.f32 %v953_v21, %v2058_v51  ;;  %v956_v25 = vadd.f32 %v953_v21, %v2060_v52  ;;  %v1281_v26 = vpop.permute.xlu0 %1280  ;;  %v1276_v52 = vmul.f32 %v1274_v27, %v1823_v14 }
 0x570   : > { %v1282_v31 = vsel %vm758_vm1, %v1279_v9, %v1281_v26  ;;  %v1283_v32 = vsel %vm758_vm1, %v1281_v26, %v1279_v9 }
 0x571   : > { %v957_v35 = vmax.f32 %v955_v24, 0.0  ;;  %v958_v36 = vmax.f32 %v956_v25, 0.0  ;;  %v1284_v37 = vmul.f32 %v1814_v10, %v1282_v31  ;;  %v1285_v51 = vmul.f32 %v1819_v11, %v1283_v32 }
 0x573   : > { %v959_v39 = vmin.f32 %v957_v35, 6.0  ;;  %v960_v40 = vmin.f32 %v958_v36, 6.0  ;;  %1296 = vmatpush.msra.mxu0 %v1284_v37  ;;  %1316 = vmatpush.msra.mxu1 %v1285_v51 }
 0x575   : > { %1297 = vmatpush.msra.mxu0 %v1276_v52  ;;  %1317 = vmatpush.msra.mxu1 %v1277_v38 }
 0x576   : > { %1378 = vmatpush.msra.mxu2 %v959_v39  ;;  %1398 = vmatpush.msra.mxu3 %v960_v40  ;;  %v1239_v59 = vpop.permute.xlu1 %1238 }
 0x577   : > { %v1263_v41 = vpop.permute.xlu0 %1262  ;;  %v1240_v63 = vsel %vm699_vm5, %v1237_v19, %v1239_v59 }
 0x578   : > { %v1243_v2 = vmul.f32 %v1240_v63, %v1890_v49 }
 0x57f   : > { %v1265_v42 = vpop.permute.xlu0 %1264 }
 0x580   : > { %v1266_v43 = vsel %vm736_vm2, %v1263_v41, %v1265_v42  ;;  %v1267_v10 = vsel %vm736_vm2, %v1265_v42, %v1263_v41 }
 0x581   : > { %v1268_v11 = vmul.f32 %v1266_v43, %v1839_v22  ;;  %v1269_v14 = vmul.f32 %v1267_v10, %v1842_v23  ;;  %v1252_v22 = vmul.f32 %v2099_v3, %v1860_v33  ;;  %v1253_v23 = vmul.f32 %v2101_v4, %v1863_v34 }
 0x583   : > { %1298 = vmatpush.msra.mxu0 %v1268_v11  ;;  %1318 = vmatpush.msra.mxu1 %v1269_v14 }
 0x587   : > { %v1255_v44 = vpop.permute.xlu0 %1254 }
 0x588   : > { %v1258_v47 = vsel %vm725_vm3, %v1255_v44, %v1257_v18  ;;  %v1259_v50 = vsel %vm725_vm3, %v1257_v18, %v1255_v44 }
 0x589   : > { %v1260_v53 = vmul.f32 %v1258_v47, %v1852_v29  ;;  %v1261_v56 = vmul.f32 %v1259_v50, %v1855_v30  ;;  %v1241_v29 = vsel %vm699_vm5, %v1239_v59, %v1237_v19 }
 0x58a   : > { %v1242_v1 = vmul.f32 %v1241_v29, %v1887_v48 }
 0x58b   : > { %1299 = vmatpush.msra.mxu0 %v1260_v53  ;;  %1319 = vmatpush.msra.mxu1 %v1261_v56 }
 0x58d   : > { %1300 = vmatpush.msra.mxu0 %v1252_v22  ;;  %1320 = vmatpush.msra.mxu1 %v1253_v23 }
 0x58f   : > { %v1247_v62 = vpop.permute.xlu0 %1246 }
 0x590   : > { %v1248_v30 = vsel %vm710_vm4, %v1245_v15, %v1247_v62  ;;  %v1249_v0 = vsel %vm710_vm4, %v1247_v62, %v1245_v15 }
 0x591   : > { %v1250_v33 = vmul.f32 %v1249_v0, %v1880_v45  ;;  %v1251_v34 = vmul.f32 %v1248_v30, %v1883_v46  ;;  %v1221_v46 = vpop.permute.xlu1 %1220 }
 0x593   : > { %1301 = vmatpush.msra.mxu0 %v1250_v33  ;;  %1321 = vmatpush.msra.mxu1 %v1251_v34 }
 0x595   : > { %1302 = vmatpush.msra.mxu0 %v1242_v1  ;;  %1322 = vmatpush.msra.mxu1 %v1243_v2 }
 0x597   : > { %v1229_v3 = vpop.permute.xlu0 %1228 }
 0x598   : > { %v1232_v4 = vsel %vm688_vm6, %v1229_v3, %v1231_v8  ;;  %v1233_v12 = vsel %vm688_vm6, %v1231_v8, %v1229_v3 }
 0x599   : > { %v1234_v13 = vmul.f32 %v1233_v12, %v1906_v60  ;;  %v1235_v45 = vmul.f32 %v1232_v4, %v1909_v61  ;;  %v1219_v60 = vld [vmem:[%s2242_s15] sm:$0xff]  ;;  %v1343_v6 = vpop.permute.xlu1 %1342 }
 0x59a   : > { %v1359_v61 = vld [vmem:[%s2292_s30] sm:$0xff]  ;;  %v1344_v9 = vrot.slane %v1343_v6, 4 }
 0x59b   : > { %1303 = vmatpush.msra.mxu0 %v1234_v13  ;;  %1323 = vmatpush.msra.mxu1 %v1235_v45 }
 0x59c   : > { %1586 = vmatmul.msk.f32.vlgmr.msra.gmra.mxu2 %vm979_vm9, %v1359_v61  ;;  %1587 = vmatmul.msk.f32.vlgmr.msra.gmra.mxu3 %vm979_vm9, %v1359_v61 }
 0x59f   : > { %v1223_v48 = vpop.permute.xlu0 %1222 }
 0x5a0   : > { %v1224_v49 = vsel %vm677_vm7, %v1221_v46, %v1223_v48  ;;  %v1225_v16 = vsel %vm677_vm7, %v1223_v48, %v1221_v46 }
 0x5a1   : > { %v1226_v17 = vmul.f32 %v1225_v16, %v1919_v5  ;;  %v1227_v18 = vmul.f32 %v1224_v49, %v1922_v7 }
 0x5a3   : > { %1304 = vmatpush.msra.mxu0 %v1226_v17  ;;  %1324 = vmatpush.msra.mxu1 %v1227_v18 }
 0x5a4   : > { %1584 = vmatmul.msk.f32.vlgmr.msra.gmra.mxu0 %vm771_vm8, %v1219_v60  ;;  %1585 = vmatmul.msk.f32.vlgmr.msra.gmra.mxu1 %vm771_vm8, %v1219_v60 }
 0x5a7   : > { %v1462_v47 = vpop.permute.xlu0 %1461 }
 0x61f   : > { %v1380_v43 = vpop.f32.mrf.mxu2  ;;  %v1400_v10 = vpop.f32.mrf.mxu3 }
 0x621   : > { %v1306_v5 = vpop.f32.mrf.mxu0  ;;  %v1326_v7 = vpop.f32.mrf.mxu1 }
 0x622   : > { %v1331_v19 = vrot.slane %v1306_v5, 4  ;;  %v1332_v8 = vrot.slane %v1326_v7, 4 }
 0x624   : > { %v1335_v20 = vadd.f32 %v1331_v19, %v2065_v57  ;;  %v1337_v21 = vadd.f32 %v1331_v19, %v2095_v54  ;;  %v1336_v24 = vadd.f32 %v1332_v8, %v2067_v58  ;;  %v1338_v25 = vadd.f32 %v1332_v8, %v2097_v55  ;;  %v1358_v58 = vld [vmem:[%s2293_s28] sm:$0xff] }
 0x626   : > { %v1346_v26 = vadd.f32 %v1344_v9, %v1335_v20  ;;  %v1348_v27 = vadd.f32 %v1344_v9, %v1337_v21  ;;  %v1347_v28 = vadd.f32 %v1344_v9, %v1336_v24  ;;  %v1349_v31 = vadd.f32 %v1344_v9, %v1338_v25 }
 0x628   : > { %v1350_v32 = vmax.f32 %v1346_v26, 0.0  ;;  %v1352_v35 = vmax.f32 %v1348_v27, 0.0  ;;  %v1351_v36 = vmax.f32 %v1347_v28, 0.0  ;;  %v1353_v37 = vmax.f32 %v1349_v31, 0.0 }
 0x62a   : > { %v1354_v51 = vmin.f32 %v1350_v32, 6.0  ;;  %v1356_v52 = vmin.f32 %v1352_v35, 6.0  ;;  %v1355_v38 = vmin.f32 %v1351_v36, 6.0  ;;  %v1357_v39 = vmin.f32 %v1353_v37, 6.0 }
 0x62c   : > { %v1407_v40 = vrot.slane %v1354_v51, 4  ;;  %v1408_v57 = vrot.slane %v1356_v52, 4  ;;  %v1410_v41 = vrot.slane %v1355_v38, 4  ;;  %v1411_v54 = vrot.slane %v1357_v39, 4 }
 0x62e   : > { %v1409_v55 = vsel %vm1042_vm10, %v1407_v40, %v1408_v57  ;;  %v1412_v42 = vsel %vm1042_vm10, %v1410_v41, %v1411_v54 }
 0x62f   : > { %1433 = vmatpush.msrb.mxu2 %v1409_v55  ;;  %1453 = vmatpush.msrb.mxu3 %v1412_v42 }
 0x630   : > { %1588 = vmatmul.msk.f32.vlgmr.msrb.gmra.mxu2 %vm979_vm9, %v1358_v58  ;;  %1589 = vmatmul.msk.f32.vlgmr.msrb.gmra.mxu3 %vm979_vm9, %v1358_v58 }
 0x6b3   : > { %v1435_v11 = vpop.f32.mrf.mxu2  ;;  %v1455_v14 = vpop.f32.mrf.mxu3 }
 0x6b4   : > { %v1436_v15 = vadd.f32 %v1435_v11, %v1380_v43  ;;  %v1456_v44 = vadd.f32 %v1455_v14, %v1400_v10 }
 0x6b6   : > { %v1464_v50 = vadd.f32 %v1462_v47, %v1436_v15  ;;  %v1465_v53 = vadd.f32 %v1462_v47, %v1456_v44 }
 0x6b8   : > { %v1466_v56 = vmax.f32 %v1464_v50, 0.0  ;;  %v1467_v22 = vmax.f32 %v1465_v53, 0.0 }
 0x6ba   : > { %v1468_v23 = vmin.f32 %v1466_v56, 6.0  ;;  %v1469_v59 = vmin.f32 %v1467_v22, 6.0 }
 0x6bc   : > { %1470 = vst [vmem:[%s663_s1] sm:$0xff] %v1468_v23 }
 0x6bd   : > { %1471 = vst [vmem:[%s663_s1 + $0x8] sm:$0xff] %v1469_v59 }
 0x6be PF: > { %s2296_s26 = sld [smem:[#allocation2_spill]] }
 0x6c4   : > { %s30_s1 = sadd.s32 1, %s2296_s26  }
 0x6c5   : > { %p27_p4 = scmp.ge.s32.totalorder %s30_s1, 4  }
 0x6c7   :  { %29 = sbr.rel (!%p27_p4) target bundleno = 10 (0xa), region = 136 }

</bundles_post_ra>
